<compile_context>
chip_gen: v7x
topology: tpu7x:2x2x1
jax: 0.10.0
libtpu: 0.0.40
codegen_flags: <defaults>
</compile_context>

<pallas_src>
import functools

import jax
import jax.numpy as jnp
from jax.experimental import pallas as pl
from jax.experimental.pallas import tpu as pltpu

LANE = 128  # packed head-output lane width


# ----------------------------------------------------------------------------
# helpers (traced inside kernels)
# ----------------------------------------------------------------------------
def _layernorm(x, gamma, beta, eps=1e-7):
    # single-pass E[x^2] - E[x]^2 form: the two cross-lane reductions are
    # independent (halves the XLU dependency chain vs. two-pass mean/var).
    mu = jnp.mean(x, axis=-1, keepdims=True)
    ex2 = jnp.mean(x * x, axis=-1, keepdims=True)
    var = jnp.maximum(ex2 - mu * mu, 0.0)
    return (x - mu) * jax.lax.rsqrt(var + eps) * gamma + beta


def _gelu(x):
    # TODO(synk): tanh approximation; PyTorch nn.GELU defaults to exact erf.
    return 0.5 * x * (1.0 + jnp.tanh(0.7978845608028654 * (x + 0.044715 * x * x * x)))


# ----------------------------------------------------------------------------
# Kernel 1: full encoder stack (grid over layers, weights streamed per layer)
#           + fused "mean of last 4 hidden states" epilogue
# ----------------------------------------------------------------------------
def encoder_stack_kernel(x0_ref, bias_ref, wqkv_ref, bqkv_ref, wo_ref, bo_ref,
                         w1_ref, b1_ref, w2_ref, b2_ref, ln1_ref, ln2_ref,
                         out_ref, h_ref, *, batch, seq):
    layer = pl.program_id(0)
    n_layers = pl.num_programs(0)

    @pl.when(layer == 0)
    def _():
        h_ref[...] = x0_ref[...]                     # hidden_states[0] (embeddings)

    x = h_ref[...]                                   # (B*L, H) f32
    hdim = x.shape[-1]
    xb = x.astype(jnp.bfloat16)

    # --- self attention (single big (B*L, H) x (H, 3H) bf16 matmul) ---
    qkv = jnp.dot(xb, wqkv_ref[0], preferred_element_type=jnp.float32) + bqkv_ref[0]
    q = qkv[:, 0 * hdim:1 * hdim].astype(jnp.bfloat16).reshape(batch, seq, hdim)
    k = qkv[:, 1 * hdim:2 * hdim].astype(jnp.bfloat16).reshape(batch, seq, hdim)
    v = qkv[:, 2 * hdim:3 * hdim].astype(jnp.bfloat16).reshape(batch, seq, hdim)

    scale = 1.0 / jnp.sqrt(jnp.float32(hdim))
    scores = jnp.einsum('bqd,bkd->bqk', q, k,
                        preferred_element_type=jnp.float32) * scale        # (B,L,L)
    scores = scores + bias_ref[...]                  # hoisted additive key mask (B,1,L)
    scores = scores - jnp.max(scores, axis=-1, keepdims=True)
    p = jnp.exp(scores)
    p = p * pl.reciprocal(jnp.sum(p, axis=-1, keepdims=True), approx=True)  # EUP

    ctx = jnp.einsum('bqk,bkd->bqd', p.astype(jnp.bfloat16), v,
                     preferred_element_type=jnp.float32)                    # (B,L,H)
    ctx2 = ctx.reshape(batch * seq, hdim)
    attn_out = jnp.dot(ctx2.astype(jnp.bfloat16), wo_ref[0],
                       preferred_element_type=jnp.float32) + bo_ref[0]

    ln1 = ln1_ref[0]                                 # (2, H): gamma / beta
    h1 = _layernorm(x + attn_out, ln1[0:1, :], ln1[1:2, :])

    # --- feed-forward ---
    f = _gelu(jnp.dot(h1.astype(jnp.bfloat16), w1_ref[0],
                      preferred_element_type=jnp.float32) + b1_ref[0])
    ffn_out = jnp.dot(f.astype(jnp.bfloat16), w2_ref[0],
                      preferred_element_type=jnp.float32) + b2_ref[0]

    ln2 = ln2_ref[0]
    h2 = _layernorm(h1 + ffn_out, ln2[0:1, :], ln2[1:2, :])
    h_ref[...] = h2

    # --- Encoder.forward epilogue: mean of last 4 hidden states, accumulated
    #     directly in the resident output block (assumes n_layers >= 4) ---
    @pl.when(layer == n_layers - 4)
    def _():
        out_ref[...] = h2 * 0.25

    @pl.when(layer > n_layers - 4)
    def _():
        out_ref[...] += h2 * 0.25


def encoder_stack(x0, bias, params, batch, seq):
    n_layers = params["wqkv"].shape[0]
    assert n_layers >= 4, "last-4 hidden-state mean assumes >= 4 layers"
    bl, hdim = x0.shape
    ffn = params["w1"].shape[-1]
    kernel = functools.partial(encoder_stack_kernel, batch=batch, seq=seq)
    # TODO(synk): on v7x, add a leading 'parallel' batch-split grid axis so
    # both TensorCores get work; single grid axis keeps it simple here.
    return pl.pallas_call(
        kernel,
        out_shape=jax.ShapeDtypeStruct((bl, hdim), jnp.float32),
        grid=(n_layers,),
        in_specs=[
            pl.BlockSpec((bl, hdim), lambda l: (0, 0)),             # x0 (resident)
            pl.BlockSpec((batch, 1, seq), lambda l: (0, 0, 0)),     # mask bias
            pl.BlockSpec((1, hdim, 3 * hdim), lambda l: (l, 0, 0)),  # wqkv (streamed)
            pl.BlockSpec((1, 1, 3 * hdim), lambda l: (l, 0, 0)),
            pl.BlockSpec((1, hdim, hdim), lambda l: (l, 0, 0)),
            pl.BlockSpec((1, 1, hdim), lambda l: (l, 0, 0)),
            pl.BlockSpec((1, hdim, ffn), lambda l: (l, 0, 0)),
            pl.BlockSpec((1, 1, ffn), lambda l: (l, 0, 0)),
            pl.BlockSpec((1, ffn, hdim), lambda l: (l, 0, 0)),
            pl.BlockSpec((1, 1, hdim), lambda l: (l, 0, 0)),
            pl.BlockSpec((1, 2, hdim), lambda l: (l, 0, 0)),
            pl.BlockSpec((1, 2, hdim), lambda l: (l, 0, 0)),
        ],
        out_specs=pl.BlockSpec((bl, hdim), lambda l: (0, 0)),
        scratch_shapes=[pltpu.VMEM((bl, hdim), jnp.float32)],       # running hidden state
        compiler_params=pltpu.CompilerParams(
            dimension_semantics=("arbitrary",),                     # layers are sequential
            vmem_limit_bytes=64 * 1024 * 1024),
    )(x0, bias, params["wqkv"], params["bqkv"], params["wo"], params["bo"],
      params["w1"], params["b1"], params["w2"], params["b2"],
      params["ln1"], params["ln2"])


# ----------------------------------------------------------------------------
# Kernel 2: EBEM head — all tables in one grid step, packed lane-dense output
#   packed[:, 0] = CircleLoss, packed[:, 1] = argmax pred, packed[:, 2:2+G] = logits
# ----------------------------------------------------------------------------
def ebem_head_kernel(ctx_ref, gloss_ref, label_ref, out_ref, *, m, gamma):
    ctx_tok = ctx_ref[...]                                   # (T, Ttgt, H)
    gl = gloss_ref[...]                                      # (T, G, H)
    labels = label_ref[...]                                  # (T, G)

    ctx = jnp.mean(ctx_tok, axis=1, keepdims=True)           # (T, 1, H) target-token mean

    # cosine similarity (CircleLoss default distance): (T, G)
    eps = 1e-12
    ctx_n = ctx * jax.lax.rsqrt(jnp.sum(ctx * ctx, axis=-1, keepdims=True) + eps)
    gl_n = gl * jax.lax.rsqrt(jnp.sum(gl * gl, axis=-1, keepdims=True) + eps)
    sims = jnp.einsum('tqh,tgh->tqg', ctx_n, gl_n,
                      preferred_element_type=jnp.float32)[:, 0, :]          # (T, G)

    # pred = argmax over candidates (first occurrence, like torch argmax)
    t_dim, g = sims.shape
    col = jax.lax.broadcasted_iota(jnp.int32, (t_dim, g), 1)
    max_v = jnp.max(sims, axis=-1, keepdims=True)
    pred = jnp.min(jnp.where(sims == max_v, col, jnp.int32(g)),
                   axis=-1, keepdims=True)                                  # (T, 1) int32

    # CircleLoss (pytorch-metric-learning formulation), anchor label == 1.
    # TODO(synk): PML detaches alpha_p/alpha_n and masks zero-pair rows; this
    # forward-only kernel assumes >=1 positive and >=1 negative per table.
    pos = labels == 1.0
    neg = jnp.logical_not(pos)
    alpha_p = jnp.maximum((1.0 + m) - sims, 0.0)
    alpha_n = jnp.maximum(sims + m, 0.0)
    logit_p = -gamma * alpha_p * (sims - (1.0 - m))
    logit_n = gamma * alpha_n * (sims - m)
    neg_inf = jnp.float32(-1e30)
    lp = jnp.where(pos, logit_p, neg_inf)
    ln_ = jnp.where(neg, logit_n, neg_inf)
    mp = jnp.max(lp, axis=-1, keepdims=True)
    lse_p = mp + jnp.log(jnp.sum(jnp.exp(lp - mp), axis=-1, keepdims=True))
    mn = jnp.max(ln_, axis=-1, keepdims=True)
    lse_n = mn + jnp.log(jnp.sum(jnp.exp(ln_ - mn), axis=-1, keepdims=True))
    z = lse_p + lse_n                                                        # (T, 1)
    loss = jnp.maximum(z, 0.0) + jnp.log(1.0 + jnp.exp(-jnp.abs(z)))         # (T, 1)

    # single lane-dense (T, 128) store instead of three masked scalar stores
    pad = jnp.zeros((t_dim, out_ref.shape[-1] - (2 + g)), jnp.float32)
    out_ref[...] = jnp.concatenate(
        [loss, pred.astype(jnp.float32), sims, pad], axis=-1)


def ebem_head(ctx_tok, gloss_tgt, labels, m, gamma):
    t, ttgt, hdim = ctx_tok.shape
    g = gloss_tgt.shape[1]
    assert 2 + g <= LANE
    kernel = functools.partial(ebem_head_kernel, m=float(m), gamma=float(gamma))
    return pl.pallas_call(
        kernel,
        out_shape=jax.ShapeDtypeStruct((t, LANE), jnp.float32),
        grid=(1,),
        in_specs=[
            pl.BlockSpec((t, ttgt, hdim), lambda i: (0, 0, 0)),
            pl.BlockSpec((t, g, hdim), lambda i: (0, 0, 0)),
            pl.BlockSpec((t, g), lambda i: (0, 0)),
        ],
        out_specs=pl.BlockSpec((t, LANE), lambda i: (0, 0)),
        compiler_params=pltpu.CompilerParams(dimension_semantics=("arbitrary",)),
    )(ctx_tok, gloss_tgt, labels)


# ----------------------------------------------------------------------------
# Glue: parameter init, encoder forward, full EBEM forward
# ----------------------------------------------------------------------------
def init_encoder_params(key, vocab_size, seq_len, hidden, ffn, n_layers, scale=0.02):
    kw, kp, k0, k1, k2, k3 = jax.random.split(key, 6)

    def w(k, shape):  # bf16 weights: 2x MXU throughput, half HBM/VMEM traffic
        return (scale * jax.random.normal(k, shape, jnp.float32)).astype(jnp.bfloat16)

    ln = jnp.concatenate([jnp.ones((n_layers, 1, hidden), jnp.float32),     # gamma
                          jnp.zeros((n_layers, 1, hidden), jnp.float32)],   # beta
                         axis=1)                                            # (N, 2, H)
    return {
        "word_emb": scale * jax.random.normal(kw, (vocab_size, hidden), jnp.float32),
        "pos_emb": scale * jax.random.normal(kp, (seq_len, hidden), jnp.float32),
        "wqkv": w(k0, (n_layers, hidden, 3 * hidden)),
        "bqkv": jnp.zeros((n_layers, 1, 3 * hidden), jnp.float32),
        "wo": w(k1, (n_layers, hidden, hidden)),
        "bo": jnp.zeros((n_layers, 1, hidden), jnp.float32),
        "w1": w(k2, (n_layers, hidden, ffn)),
        "b1": jnp.zeros((n_layers, 1, ffn), jnp.float32),
        "w2": w(k3, (n_layers, ffn, hidden)),
        "b2": jnp.zeros((n_layers, 1, hidden), jnp.float32),
        "ln1": ln,
        "ln2": ln,
    }


def run_encoder(params, input_ids, attention_mask):
    """Encoder.forward: mean of last 4 hidden states; dropout(p=0) == identity."""
    b, l = input_ids.shape
    hdim = params["word_emb"].shape[1]
    h0 = params["word_emb"][input_ids] + params["pos_emb"][None, :l, :]   # embeddings
    x0 = h0.reshape(b * l, hdim).astype(jnp.float32)
    # hoisted additive key-mask bias (1=keep -> 0, 0=pad -> -1e9)
    bias = (attention_mask.astype(jnp.float32)[:, None, :] - 1.0) * 1e9   # (B, 1, L)
    out_flat = encoder_stack(x0, bias, params, b, l)
    return out_flat.reshape(b, l, hdim)


def ebem_forward(ctx_params, gloss_params,
                 context_ids, context_mask, gloss_ids, gloss_mask,
                 tables, m=0.5, gamma=32):
    context_emb = run_encoder(ctx_params, context_ids, context_mask)     # [Bc, L, H]
    gloss_emb = run_encoder(gloss_params, gloss_ids, gloss_mask)         # [Bg, L, H]

    # BEMModel.encode: gather target tokens / gloss CLS embeddings (data-dependent, JAX glue)
    ctx_tok = jnp.stack([context_emb[t["context_index"], t["target_indices"], :]
                         for t in tables])                               # [T, Ttgt, H]
    gloss_tgt = jnp.stack([gloss_emb[t["gloss_indices"], 0, :]
                           for t in tables])                             # [T, G, H]
    labels = jnp.stack([t["labels"] for t in tables]).astype(jnp.float32)  # [T, G]

    packed = ebem_head(ctx_tok, gloss_tgt, labels, m, gamma)             # [T, 128]
    g = labels.shape[1]
    losses = packed[:, 0]
    preds = packed[:, 1].astype(jnp.int32)
    logits = packed[:, 2:2 + g]
    loss = jnp.mean(losses)            # ModelOutput.loss = stack(losses).mean()
    return loss, preds, logits


# ----------------------------------------------------------------------------
if __name__ == "__main__":
    # HIDDEN/FFN chosen as multiples of 128 so every lane dim is tile-aligned.
    VOCAB, SEQ, HIDDEN, FFN, N_LAYERS = 64, 8, 128, 256, 4
    B_CTX, B_GLOSS = 2, 6

    key = jax.random.PRNGKey(0)
    k_ctx, k_gls, k_ids1, k_ids2 = jax.random.split(key, 4)

    ctx_params = init_encoder_params(k_ctx, VOCAB, SEQ, HIDDEN, FFN, N_LAYERS)
    gloss_params = init_encoder_params(k_gls, VOCAB, SEQ, HIDDEN, FFN, N_LAYERS)

    context_ids = jax.random.randint(k_ids1, (B_CTX, SEQ), 0, VOCAB, dtype=jnp.int32)
    gloss_ids = jax.random.randint(k_ids2, (B_GLOSS, SEQ), 0, VOCAB, dtype=jnp.int32)
    context_mask = jnp.ones((B_CTX, SEQ), jnp.float32)
    gloss_mask = jnp.ones((B_GLOSS, SEQ), jnp.float32)

    # Two WSD instances: (context sentence, target token span, candidate glosses, one-hot labels)
    tables = [
        {"context_index": 0,
         "target_indices": jnp.array([2, 3], dtype=jnp.int32),
         "gloss_indices": jnp.array([0, 1, 2], dtype=jnp.int32),
         "labels": jnp.array([1.0, 0.0, 0.0], jnp.float32)},
        {"context_index": 1,
         "target_indices": jnp.array([1, 4], dtype=jnp.int32),
         "gloss_indices": jnp.array([3, 4, 5], dtype=jnp.int32),
         "labels": jnp.array([0.0, 0.0, 1.0], jnp.float32)},
    ]

    loss, preds, logits = ebem_forward(
        ctx_params, gloss_params,
        context_ids, context_mask, gloss_ids, gloss_mask,
        tables, m=0.5, gamma=32)

    jax.block_until_ready((loss, preds, logits))
    assert loss.shape == () and preds.shape == (2,) and logits.shape == (2, 3)
    assert bool(jnp.isfinite(loss))
    print("KERNEL_OK")
</pallas_src>

<mosaic_0001>
module attributes {stable_mosaic.version = 11 : i64} {
  func.func @encoder_stack_kernel(%arg0: i32, %arg1: memref<16x128xf32, #tpu.memory_space<vmem>>, %arg2: memref<2x1x8xf32, #tpu.memory_space<vmem>>, %arg3: memref<1x128x384xbf16, #tpu.memory_space<vmem>>, %arg4: memref<1x1x384xf32, #tpu.memory_space<vmem>>, %arg5: memref<1x128x128xbf16, #tpu.memory_space<vmem>>, %arg6: memref<1x1x128xf32, #tpu.memory_space<vmem>>, %arg7: memref<1x128x256xbf16, #tpu.memory_space<vmem>>, %arg8: memref<1x1x256xf32, #tpu.memory_space<vmem>>, %arg9: memref<1x256x128xbf16, #tpu.memory_space<vmem>>, %arg10: memref<1x1x128xf32, #tpu.memory_space<vmem>>, %arg11: memref<1x2x128xf32, #tpu.memory_space<vmem>>, %arg12: memref<1x2x128xf32, #tpu.memory_space<vmem>>, %arg13: memref<16x128xf32, #tpu.memory_space<vmem>>, %arg14: memref<16x128xf32, #tpu.memory_space<vmem>>) attributes {dimension_semantics = [#tpu.dimension_semantics<arbitrary>], iteration_bounds = array<i64: 4>, scalar_prefetch = 0 : i64, scratch_operands = 1 : i64, tpu.core_type = #tpu.core_type<tc>, window_params = [{pipeline_mode = #tpu.pipeline_mode<synchronous>, transform_indices = @transform_0, window_bounds = array<i64: 16, 128>}, {pipeline_mode = #tpu.pipeline_mode<synchronous>, transform_indices = @transform_1, window_bounds = array<i64: 2, 1, 8>}, {transform_indices = @transform_2, window_bounds = array<i64: 1, 128, 384>}, {transform_indices = @transform_3, window_bounds = array<i64: 1, 1, 384>}, {transform_indices = @transform_4, window_bounds = array<i64: 1, 128, 128>}, {transform_indices = @transform_5, window_bounds = array<i64: 1, 1, 128>}, {transform_indices = @transform_6, window_bounds = array<i64: 1, 128, 256>}, {transform_indices = @transform_7, window_bounds = array<i64: 1, 1, 256>}, {transform_indices = @transform_8, window_bounds = array<i64: 1, 256, 128>}, {transform_indices = @transform_9, window_bounds = array<i64: 1, 1, 128>}, {transform_indices = @transform_10, window_bounds = array<i64: 1, 2, 128>}, {transform_indices = @transform_11, window_bounds = array<i64: 1, 2, 128>}, {pipeline_mode = #tpu.pipeline_mode<synchronous>, transform_indices = @transform_12, window_bounds = array<i64: 16, 128>}]} {
    %c0_i32 = arith.constant 0 : i32
    %0 = arith.cmpi eq, %arg0, %c0_i32 : i32
    %1 = arith.extui %0 : i1 to i32
    %c0_i32_0 = arith.constant 0 : i32
    %2 = arith.cmpi ne, %1, %c0_i32_0 : i32
    scf.if %2 {
      %c0_66 = arith.constant 0 : index
      %c0_67 = arith.constant 0 : index
      %144 = vector.load %arg1[%c0_66, %c0_67] : memref<16x128xf32, #tpu.memory_space<vmem>>, vector<16x128xf32>
      %c0_68 = arith.constant 0 : index
      %c0_69 = arith.constant 0 : index
      %145 = vector.load %arg14[%c0_68, %c0_69] : memref<16x128xf32, #tpu.memory_space<vmem>>, vector<16x128xf32>
      tpu.vector_store %arg14[%c0_68, %c0_69], %144 {strides = array<i32>} : memref<16x128xf32, #tpu.memory_space<vmem>>, vector<16x128xf32>,
    } else {
    }
    %c0 = arith.constant 0 : index
    %c0_1 = arith.constant 0 : index
    %3 = vector.load %arg14[%c0, %c0_1] : memref<16x128xf32, #tpu.memory_space<vmem>>, vector<16x128xf32>
    %4 = arith.truncf %3 : vector<16x128xf32> to vector<16x128xbf16>
    %c0_2 = arith.constant 0 : index
    %c0_3 = arith.constant 0 : index
    %c0_4 = arith.constant 0 : index
    %5 = vector.load %arg3[%c0_2, %c0_3, %c0_4] : memref<1x128x384xbf16, #tpu.memory_space<vmem>>, vector<1x128x384xbf16>
    %6 = vector.shape_cast %5 : vector<1x128x384xbf16> to vector<128x384xbf16>
    %cst = arith.constant dense<0.000000e+00> : vector<16x384xf32>
    %7 = tpu.matmul %4, %6, %cst {dimension_numbers = #tpu.dot_dimension_numbers<[1], [0], [0], [1], [0, 0, 1, 1], [], []>} : vector<16x128xbf16>, vector<128x384xbf16>, vector<16x384xf32> -> vector<16x384xf32>
    %c0_5 = arith.constant 0 : index
    %c0_6 = arith.constant 0 : index
    %c0_7 = arith.constant 0 : index
    %8 = vector.load %arg4[%c0_5, %c0_6, %c0_7] : memref<1x1x384xf32, #tpu.memory_space<vmem>>, vector<1x1x384xf32>
    %9 = vector.shape_cast %8 : vector<1x1x384xf32> to vector<1x384xf32>
    %10 = vector.broadcast %9 : vector<1x384xf32> to vector<16x384xf32>
    %11 = arith.addf %7, %10 : vector<16x384xf32>
    %12 = vector.extract_strided_slice %11 {offsets = [0, 0], sizes = [16, 128], strides = [1, 1]} : vector<16x384xf32> to vector<16x128xf32>
    %13 = arith.truncf %12 : vector<16x128xf32> to vector<16x128xbf16>
    %14 = vector.shape_cast %13 : vector<16x128xbf16> to vector<2x8x128xbf16>
    %15 = vector.extract_strided_slice %11 {offsets = [0, 128], sizes = [16, 128], strides = [1, 1]} : vector<16x384xf32> to vector<16x128xf32>
    %16 = arith.truncf %15 : vector<16x128xf32> to vector<16x128xbf16>
    %17 = vector.shape_cast %16 : vector<16x128xbf16> to vector<2x8x128xbf16>
    %18 = vector.extract_strided_slice %11 {offsets = [0, 256], sizes = [16, 128], strides = [1, 1]} : vector<16x384xf32> to vector<16x128xf32>
    %19 = arith.truncf %18 : vector<16x128xf32> to vector<16x128xbf16>
    %20 = vector.shape_cast %19 : vector<16x128xbf16> to vector<2x8x128xbf16>
    %cst_8 = arith.constant 1.280000e+02 : f32
    %21 = math.sqrt %cst_8 : f32
    %cst_9 = arith.constant 1.000000e+00 : f32
    %22 = arith.divf %cst_9, %21 : f32
    "tpu.trace_start"() <{level = 10 : i32, message = "bqd,bkd->bqk"}> : () -> ()
    %cst_10 = arith.constant dense<0.000000e+00> : vector<2x8x8xf32>
    %23 = tpu.matmul %14, %17, %cst_10 {dimension_numbers = #tpu.dot_dimension_numbers<[2], [2], [1], [1], [0, 0, 0, 1, 1, 1], [0], [0]>} : vector<2x8x128xbf16>, vector<2x8x128xbf16>, vector<2x8x8xf32> -> vector<2x8x8xf32>
    "tpu.trace_stop"() : () -> ()
    %24 = vector.broadcast %22 : f32 to vector<2x8x8xf32>
    %25 = arith.mulf %23, %24 : vector<2x8x8xf32>
    %c0_11 = arith.constant 0 : index
    %c0_12 = arith.constant 0 : index
    %c0_13 = arith.constant 0 : index
    %26 = vector.load %arg2[%c0_11, %c0_12, %c0_13] : memref<2x1x8xf32, #tpu.memory_space<vmem>>, vector<2x1x8xf32>
    %27 = vector.broadcast %26 : vector<2x1x8xf32> to vector<2x8x8xf32>
    %28 = arith.addf %25, %27 : vector<2x8x8xf32>
    %cst_14 = arith.constant dense<0xFF800000> : vector<2x8xf32>
    %29 = vector.multi_reduction <maximumf>, %28, %cst_14 [2] : vector<2x8x8xf32> to vector<2x8xf32>
    %30 = vector.shape_cast %29 : vector<2x8xf32> to vector<2x8x1xf32>
    %31 = vector.broadcast %30 : vector<2x8x1xf32> to vector<2x8x8xf32>
    %32 = arith.subf %28, %31 : vector<2x8x8xf32>
    %33 = math.exp %32 : vector<2x8x8xf32>
    %cst_15 = arith.constant dense<0.000000e+00> : vector<2x8xf32>
    %34 = vector.multi_reduction <add>, %33, %cst_15 [2] : vector<2x8x8xf32> to vector<2x8xf32>
    %35 = vector.shape_cast %34 : vector<2x8xf32> to vector<2x8x1xf32>
    %36 = tpu.reciprocal %35 {approx = true} : vector<2x8x1xf32> -> vector<2x8x1xf32>
    %37 = vector.broadcast %36 : vector<2x8x1xf32> to vector<2x8x8xf32>
    %38 = arith.mulf %33, %37 : vector<2x8x8xf32>
    %39 = arith.truncf %38 : vector<2x8x8xf32> to vector<2x8x8xbf16>
    "tpu.trace_start"() <{level = 10 : i32, message = "bqk,bkd->bqd"}> : () -> ()
    %cst_16 = arith.constant dense<0.000000e+00> : vector<2x8x128xf32>
    %40 = tpu.matmul %39, %20, %cst_16 {dimension_numbers = #tpu.dot_dimension_numbers<[2], [1], [1], [2], [0, 0, 0, 1, 1, 2], [0], [0]>} : vector<2x8x8xbf16>, vector<2x8x128xbf16>, vector<2x8x128xf32> -> vector<2x8x128xf32>
    "tpu.trace_stop"() : () -> ()
    %41 = vector.shape_cast %40 : vector<2x8x128xf32> to vector<16x128xf32>
    %42 = arith.truncf %41 : vector<16x128xf32> to vector<16x128xbf16>
    %c0_17 = arith.constant 0 : index
    %c0_18 = arith.constant 0 : index
    %c0_19 = arith.constant 0 : index
    %43 = vector.load %arg5[%c0_17, %c0_18, %c0_19] : memref<1x128x128xbf16, #tpu.memory_space<vmem>>, vector<1x128x128xbf16>
    %44 = vector.shape_cast %43 : vector<1x128x128xbf16> to vector<128x128xbf16>
    %cst_20 = arith.constant dense<0.000000e+00> : vector<16x128xf32>
    %45 = tpu.matmul %42, %44, %cst_20 {dimension_numbers = #tpu.dot_dimension_numbers<[1], [0], [0], [1], [0, 0, 1, 1], [], []>} : vector<16x128xbf16>, vector<128x128xbf16>, vector<16x128xf32> -> vector<16x128xf32>
    %c0_21 = arith.constant 0 : index
    %c0_22 = arith.constant 0 : index
    %c0_23 = arith.constant 0 : index
    %46 = vector.load %arg6[%c0_21, %c0_22, %c0_23] : memref<1x1x128xf32, #tpu.memory_space<vmem>>, vector<1x1x128xf32>
    %47 = vector.shape_cast %46 : vector<1x1x128xf32> to vector<1x128xf32>
    %48 = vector.broadcast %47 : vector<1x128xf32> to vector<16x128xf32>
    %49 = arith.addf %45, %48 : vector<16x128xf32>
    %c0_24 = arith.constant 0 : index
    %c0_25 = arith.constant 0 : index
    %c0_26 = arith.constant 0 : index
    %50 = vector.load %arg11[%c0_24, %c0_25, %c0_26] : memref<1x2x128xf32, #tpu.memory_space<vmem>>, vector<1x2x128xf32>
    %51 = vector.shape_cast %50 : vector<1x2x128xf32> to vector<2x128xf32>
    %52 = arith.addf %3, %49 : vector<16x128xf32>
    %53 = vector.extract_strided_slice %51 {offsets = [0, 0], sizes = [1, 128], strides = [1, 1]} : vector<2x128xf32> to vector<1x128xf32>
    %54 = vector.extract_strided_slice %51 {offsets = [1, 0], sizes = [1, 128], strides = [1, 1]} : vector<2x128xf32> to vector<1x128xf32>
    %cst_27 = arith.constant dense<0.000000e+00> : vector<16xf32>
    %55 = vector.multi_reduction <add>, %52, %cst_27 [1] : vector<16x128xf32> to vector<16xf32>
    %56 = vector.shape_cast %55 : vector<16xf32> to vector<16x1xf32>
    %cst_28 = arith.constant 1.280000e+02 : f32
    %57 = vector.broadcast %cst_28 : f32 to vector<16x1xf32>
    %58 = arith.divf %56, %57 : vector<16x1xf32>
    %59 = arith.mulf %52, %52 : vector<16x128xf32>
    %cst_29 = arith.constant dense<0.000000e+00> : vector<16xf32>
    %60 = vector.multi_reduction <add>, %59, %cst_29 [1] : vector<16x128xf32> to vector<16xf32>
    %61 = vector.shape_cast %60 : vector<16xf32> to vector<16x1xf32>
    %cst_30 = arith.constant 1.280000e+02 : f32
    %62 = vector.broadcast %cst_30 : f32 to vector<16x1xf32>
    %63 = arith.divf %61, %62 : vector<16x1xf32>
    %64 = arith.mulf %58, %58 : vector<16x1xf32>
    %65 = arith.subf %63, %64 : vector<16x1xf32>
    %cst_31 = arith.constant 0.000000e+00 : f32
    %66 = vector.broadcast %cst_31 : f32 to vector<16x1xf32>
    %67 = arith.maximumf %65, %66 : vector<16x1xf32>
    %68 = vector.broadcast %58 : vector<16x1xf32> to vector<16x128xf32>
    %69 = arith.subf %52, %68 : vector<16x128xf32>
    %cst_32 = arith.constant 1.000000e-07 : f32
    %70 = vector.broadcast %cst_32 : f32 to vector<16x1xf32>
    %71 = arith.addf %67, %70 : vector<16x1xf32>
    %72 = math.rsqrt %71 : vector<16x1xf32>
    %73 = vector.broadcast %72 : vector<16x1xf32> to vector<16x128xf32>
    %74 = arith.mulf %69, %73 : vector<16x128xf32>
    %75 = vector.broadcast %53 : vector<1x128xf32> to vector<16x128xf32>
    %76 = arith.mulf %74, %75 : vector<16x128xf32>
    %77 = vector.broadcast %54 : vector<1x128xf32> to vector<16x128xf32>
    %78 = arith.addf %76, %77 : vector<16x128xf32>
    %79 = arith.truncf %78 : vector<16x128xf32> to vector<16x128xbf16>
    %c0_33 = arith.constant 0 : index
    %c0_34 = arith.constant 0 : index
    %c0_35 = arith.constant 0 : index
    %80 = vector.load %arg7[%c0_33, %c0_34, %c0_35] : memref<1x128x256xbf16, #tpu.memory_space<vmem>>, vector<1x128x256xbf16>
    %81 = vector.shape_cast %80 : vector<1x128x256xbf16> to vector<128x256xbf16>
    %cst_36 = arith.constant dense<0.000000e+00> : vector<16x256xf32>
    %82 = tpu.matmul %79, %81, %cst_36 {dimension_numbers = #tpu.dot_dimension_numbers<[1], [0], [0], [1], [0, 0, 1, 1], [], []>} : vector<16x128xbf16>, vector<128x256xbf16>, vector<16x256xf32> -> vector<16x256xf32>
    %c0_37 = arith.constant 0 : index
    %c0_38 = arith.constant 0 : index
    %c0_39 = arith.constant 0 : index
    %83 = vector.load %arg8[%c0_37, %c0_38, %c0_39] : memref<1x1x256xf32, #tpu.memory_space<vmem>>, vector<1x1x256xf32>
    %84 = vector.shape_cast %83 : vector<1x1x256xf32> to vector<1x256xf32>
    %85 = vector.broadcast %84 : vector<1x256xf32> to vector<16x256xf32>
    %86 = arith.addf %82, %85 : vector<16x256xf32>
    %cst_40 = arith.constant 5.000000e-01 : f32
    %87 = vector.broadcast %cst_40 : f32 to vector<16x256xf32>
    %88 = arith.mulf %87, %86 : vector<16x256xf32>
    %cst_41 = arith.constant 4.471500e-02 : f32
    %89 = vector.broadcast %cst_41 : f32 to vector<16x256xf32>
    %90 = arith.mulf %89, %86 : vector<16x256xf32>
    %91 = arith.mulf %90, %86 : vector<16x256xf32>
    %92 = arith.mulf %91, %86 : vector<16x256xf32>
    %93 = arith.addf %86, %92 : vector<16x256xf32>
    %cst_42 = arith.constant 0.797884583 : f32
    %94 = vector.broadcast %cst_42 : f32 to vector<16x256xf32>
    %95 = arith.mulf %94, %93 : vector<16x256xf32>
    %96 = math.tanh %95 : vector<16x256xf32>
    %cst_43 = arith.constant 1.000000e+00 : f32
    %97 = vector.broadcast %cst_43 : f32 to vector<16x256xf32>
    %98 = arith.addf %97, %96 : vector<16x256xf32>
    %99 = arith.mulf %88, %98 : vector<16x256xf32>
    %100 = arith.truncf %99 : vector<16x256xf32> to vector<16x256xbf16>
    %c0_44 = arith.constant 0 : index
    %c0_45 = arith.constant 0 : index
    %c0_46 = arith.constant 0 : index
    %101 = vector.load %arg9[%c0_44, %c0_45, %c0_46] : memref<1x256x128xbf16, #tpu.memory_space<vmem>>, vector<1x256x128xbf16>
    %102 = vector.shape_cast %101 : vector<1x256x128xbf16> to vector<256x128xbf16>
    %cst_47 = arith.constant dense<0.000000e+00> : vector<16x128xf32>
    %103 = tpu.matmul %100, %102, %cst_47 {dimension_numbers = #tpu.dot_dimension_numbers<[1], [0], [0], [1], [0, 0, 1, 1], [], []>} : vector<16x256xbf16>, vector<256x128xbf16>, vector<16x128xf32> -> vector<16x128xf32>
    %c0_48 = arith.constant 0 : index
    %c0_49 = arith.constant 0 : index
    %c0_50 = arith.constant 0 : index
    %104 = vector.load %arg10[%c0_48, %c0_49, %c0_50] : memref<1x1x128xf32, #tpu.memory_space<vmem>>, vector<1x1x128xf32>
    %105 = vector.shape_cast %104 : vector<1x1x128xf32> to vector<1x128xf32>
    %106 = vector.broadcast %105 : vector<1x128xf32> to vector<16x128xf32>
    %107 = arith.addf %103, %106 : vector<16x128xf32>
    %c0_51 = arith.constant 0 : index
    %c0_52 = arith.constant 0 : index
    %c0_53 = arith.constant 0 : index
    %108 = vector.load %arg12[%c0_51, %c0_52, %c0_53] : memref<1x2x128xf32, #tpu.memory_space<vmem>>, vector<1x2x128xf32>
    %109 = vector.shape_cast %108 : vector<1x2x128xf32> to vector<2x128xf32>
    %110 = arith.addf %78, %107 : vector<16x128xf32>
    %111 = vector.extract_strided_slice %109 {offsets = [0, 0], sizes = [1, 128], strides = [1, 1]} : vector<2x128xf32> to vector<1x128xf32>
    %112 = vector.extract_strided_slice %109 {offsets = [1, 0], sizes = [1, 128], strides = [1, 1]} : vector<2x128xf32> to vector<1x128xf32>
    %cst_54 = arith.constant dense<0.000000e+00> : vector<16xf32>
    %113 = vector.multi_reduction <add>, %110, %cst_54 [1] : vector<16x128xf32> to vector<16xf32>
    %114 = vector.shape_cast %113 : vector<16xf32> to vector<16x1xf32>
    %cst_55 = arith.constant 1.280000e+02 : f32
    %115 = vector.broadcast %cst_55 : f32 to vector<16x1xf32>
    %116 = arith.divf %114, %115 : vector<16x1xf32>
    %117 = arith.mulf %110, %110 : vector<16x128xf32>
    %cst_56 = arith.constant dense<0.000000e+00> : vector<16xf32>
    %118 = vector.multi_reduction <add>, %117, %cst_56 [1] : vector<16x128xf32> to vector<16xf32>
    %119 = vector.shape_cast %118 : vector<16xf32> to vector<16x1xf32>
    %cst_57 = arith.constant 1.280000e+02 : f32
    %120 = vector.broadcast %cst_57 : f32 to vector<16x1xf32>
    %121 = arith.divf %119, %120 : vector<16x1xf32>
    %122 = arith.mulf %116, %116 : vector<16x1xf32>
    %123 = arith.subf %121, %122 : vector<16x1xf32>
    %cst_58 = arith.constant 0.000000e+00 : f32
    %124 = vector.broadcast %cst_58 : f32 to vector<16x1xf32>
    %125 = arith.maximumf %123, %124 : vector<16x1xf32>
    %126 = vector.broadcast %116 : vector<16x1xf32> to vector<16x128xf32>
    %127 = arith.subf %110, %126 : vector<16x128xf32>
    %cst_59 = arith.constant 1.000000e-07 : f32
    %128 = vector.broadcast %cst_59 : f32 to vector<16x1xf32>
    %129 = arith.addf %125, %128 : vector<16x1xf32>
    %130 = math.rsqrt %129 : vector<16x1xf32>
    %131 = vector.broadcast %130 : vector<16x1xf32> to vector<16x128xf32>
    %132 = arith.mulf %127, %131 : vector<16x128xf32>
    %133 = vector.broadcast %111 : vector<1x128xf32> to vector<16x128xf32>
    %134 = arith.mulf %132, %133 : vector<16x128xf32>
    %135 = vector.broadcast %112 : vector<1x128xf32> to vector<16x128xf32>
    %136 = arith.addf %134, %135 : vector<16x128xf32>
    %c0_60 = arith.constant 0 : index
    %c0_61 = arith.constant 0 : index
    %137 = vector.load %arg14[%c0_60, %c0_61] : memref<16x128xf32, #tpu.memory_space<vmem>>, vector<16x128xf32>
    tpu.vector_store %arg14[%c0_60, %c0_61], %136 {strides = array<i32>} : memref<16x128xf32, #tpu.memory_space<vmem>>, vector<16x128xf32>,
    %c0_i32_62 = arith.constant 0 : i32
    %138 = arith.cmpi eq, %arg0, %c0_i32_62 : i32
    %139 = arith.extui %138 : i1 to i32
    %c0_i32_63 = arith.constant 0 : i32
    %140 = arith.cmpi ne, %139, %c0_i32_63 : i32
    scf.if %140 {
      %cst_66 = arith.constant 2.500000e-01 : f32
      %144 = vector.broadcast %cst_66 : f32 to vector<16x128xf32>
      %145 = arith.mulf %136, %144 : vector<16x128xf32>
      %c0_67 = arith.constant 0 : index
      %c0_68 = arith.constant 0 : index
      %146 = vector.load %arg13[%c0_67, %c0_68] : memref<16x128xf32, #tpu.memory_space<vmem>>, vector<16x128xf32>
      tpu.vector_store %arg13[%c0_67, %c0_68], %145 {strides = array<i32>} : memref<16x128xf32, #tpu.memory_space<vmem>>, vector<16x128xf32>,
    } else {
    }
    %c0_i32_64 = arith.constant 0 : i32
    %141 = arith.cmpi sgt, %arg0, %c0_i32_64 : i32
    %142 = arith.extui %141 : i1 to i32
    %c0_i32_65 = arith.constant 0 : i32
    %143 = arith.cmpi ne, %142, %c0_i32_65 : i32
    scf.if %143 {
      %c0_66 = arith.constant 0 : index
      %c0_67 = arith.constant 0 : index
      %144 = vector.load %arg13[%c0_66, %c0_67] : memref<16x128xf32, #tpu.memory_space<vmem>>, vector<16x128xf32>
      %cst_68 = arith.constant 2.500000e-01 : f32
      %145 = vector.broadcast %cst_68 : f32 to vector<16x128xf32>
      %146 = arith.mulf %136, %145 : vector<16x128xf32>
      %147 = arith.addf %144, %146 : vector<16x128xf32>
      %c0_69 = arith.constant 0 : index
      %c0_70 = arith.constant 0 : index
      %148 = vector.load %arg13[%c0_69, %c0_70] : memref<16x128xf32, #tpu.memory_space<vmem>>, vector<16x128xf32>
      tpu.vector_store %arg13[%c0_69, %c0_70], %147 {strides = array<i32>} : memref<16x128xf32, #tpu.memory_space<vmem>>, vector<16x128xf32>,
    } else {
    }
    return
  }
  func.func @transform_0(%arg0: i32) -> (i32, i32) {
    %c0_i32 = arith.constant 0 : i32
    %c0_i32_0 = arith.constant 0 : i32
    %c0_i32_1 = arith.constant 0 : i32
    return %c0_i32, %c0_i32_0 : i32, i32
  }
  func.func @transform_1(%arg0: i32) -> (i32, i32, i32) {
    %c0_i32 = arith.constant 0 : i32
    %c0_i32_0 = arith.constant 0 : i32
    %c0_i32_1 = arith.constant 0 : i32
    %c0_i32_2 = arith.constant 0 : i32
    return %c0_i32, %c0_i32_0, %c0_i32_1 : i32, i32, i32
  }
  func.func @transform_2(%arg0: i32) -> (i32, i32, i32) {
    %c0_i32 = arith.constant 0 : i32
    %c0_i32_0 = arith.constant 0 : i32
    %c0_i32_1 = arith.constant 0 : i32
    return %arg0, %c0_i32, %c0_i32_0 : i32, i32, i32
  }
  func.func @transform_3(%arg0: i32) -> (i32, i32, i32) {
    %c0_i32 = arith.constant 0 : i32
    %c0_i32_0 = arith.constant 0 : i32
    %c0_i32_1 = arith.constant 0 : i32
    return %arg0, %c0_i32, %c0_i32_0 : i32, i32, i32
  }
  func.func @transform_4(%arg0: i32) -> (i32, i32, i32) {
    %c0_i32 = arith.constant 0 : i32
    %c0_i32_0 = arith.constant 0 : i32
    %c0_i32_1 = arith.constant 0 : i32
    return %arg0, %c0_i32, %c0_i32_0 : i32, i32, i32
  }
  func.func @transform_5(%arg0: i32) -> (i32, i32, i32) {
    %c0_i32 = arith.constant 0 : i32
    %c0_i32_0 = arith.constant 0 : i32
    %c0_i32_1 = arith.constant 0 : i32
    return %arg0, %c0_i32, %c0_i32_0 : i32, i32, i32
  }
  func.func @transform_6(%arg0: i32) -> (i32, i32, i32) {
    %c0_i32 = arith.constant 0 : i32
    %c0_i32_0 = arith.constant 0 : i32
    %c0_i32_1 = arith.constant 0 : i32
    return %arg0, %c0_i32, %c0_i32_0 : i32, i32, i32
  }
  func.func @transform_7(%arg0: i32) -> (i32, i32, i32) {
    %c0_i32 = arith.constant 0 : i32
    %c0_i32_0 = arith.constant 0 : i32
    %c0_i32_1 = arith.constant 0 : i32
    return %arg0, %c0_i32, %c0_i32_0 : i32, i32, i32
  }
  func.func @transform_8(%arg0: i32) -> (i32, i32, i32) {
    %c0_i32 = arith.constant 0 : i32
    %c0_i32_0 = arith.constant 0 : i32
    %c0_i32_1 = arith.constant 0 : i32
    return %arg0, %c0_i32, %c0_i32_0 : i32, i32, i32
  }
  func.func @transform_9(%arg0: i32) -> (i32, i32, i32) {
    %c0_i32 = arith.constant 0 : i32
    %c0_i32_0 = arith.constant 0 : i32
    %c0_i32_1 = arith.constant 0 : i32
    return %arg0, %c0_i32, %c0_i32_0 : i32, i32, i32
  }
  func.func @transform_10(%arg0: i32) -> (i32, i32, i32) {
    %c0_i32 = arith.constant 0 : i32
    %c0_i32_0 = arith.constant 0 : i32
    %c0_i32_1 = arith.constant 0 : i32
    return %arg0, %c0_i32, %c0_i32_0 : i32, i32, i32
  }
  func.func @transform_11(%arg0: i32) -> (i32, i32, i32) {
    %c0_i32 = arith.constant 0 : i32
    %c0_i32_0 = arith.constant 0 : i32
    %c0_i32_1 = arith.constant 0 : i32
    return %arg0, %c0_i32, %c0_i32_0 : i32, i32, i32
  }
  func.func @transform_12(%arg0: i32) -> (i32, i32) {
    %c0_i32 = arith.constant 0 : i32
    %c0_i32_0 = arith.constant 0 : i32
    %c0_i32_1 = arith.constant 0 : i32
    return %c0_i32, %c0_i32_0 : i32, i32
  }
}

</mosaic_0001>

<bundles_post_ra>
// kernel: tpu_custom_call.1
= control target key start
LH: loop header
LB: loop body
LE: loop exit
PB: predicated region body
PF: predicated region fallthrough
CT: control target
= control target key end

     0   :  { %s3764_s0 = inlined_call_operand.hbm [shape: f32[16,128], index: 0, kind: input, shape index: {}]   ;;  %s3765_s1 = inlined_call_operand.hbm [shape: f32[2,1,8], index: 1, kind: input, shape index: {}]   ;;  %s3766_s2 = inlined_call_operand.hbm [shape: bf16[4,128,384], index: 2, kind: input, shape index: {}]   ;;  %s3767_s3 = inlined_call_operand.hbm [shape: f32[4,1,384], index: 3, kind: input, shape index: {}]   ;;  %s3768_s4 = inlined_call_operand.hbm [shape: bf16[4,128,128], index: 4, kind: input, shape index: {}]   ;;  %s3769_s5 = inlined_call_operand.hbm [shape: f32[4,1,128], index: 5, kind: input, shape index: {}]   ;;  %s3770_s6 = inlined_call_operand.hbm [shape: bf16[4,128,256], index: 6, kind: input, shape index: {}]   ;;  %s3771_s7 = inlined_call_operand.hbm [shape: f32[4,1,256], index: 7, kind: input, shape index: {}]   ;;  %s3772_s8 = inlined_call_operand.hbm [shape: bf16[4,256,128], index: 8, kind: input, shape index: {}]   ;;  %s3773_s9 = inlined_call_operand.hbm [shape: f32[4,1,128], index: 9, kind: input, shape index: {}]   ;;  %s3774_s10 = inlined_call_operand.hbm [shape: f32[4,2,128], index: 10, kind: input, shape index: {}]   ;;  %s3775_s11 = inlined_call_operand.hbm [shape: f32[4,2,128], index: 11, kind: input, shape index: {}]   ;;  %s3776_s12 = inlined_call_operand.hbm [shape: f32[16,128], index: 12, kind: output, shape index: {}]  }
   0x1   :  { %3805 = sst [smem:[#allocation30_spill]] %s3764_s0 }
   0x2   :  { %3806 = sst [smem:[#allocation31_spill]] %s3766_s2 }
   0x3   :  { %3807 = sst [smem:[#allocation32_spill]] %s3776_s12 }
   0x4   :  { %17 = vsyncpa [#allocation4], 0 }
   0x5   :  { %18 = vsyncpa [#allocation7], 0 }
   0x6   :  { %19 = vsyncpa [#allocation5], 0  ;;  %s3103_s21 = smov 0   ;;  %s3105_s22 = smov 0  }
   0x7   :  { %s3107_s23 = smov 0   ;;  %s3109_s24 = smov 0  }
   0x8 LB: > { %3808 = sst [smem:[#allocation23_spill]] %s3002_s22  ;;  %s3122_s25 = sadd.s32 4294967295, %s3010_s24   ;;  %s3010_s24 = sphi %s3109_s24, %s3854_s24   ;;  %s3006_s23 = sphi %s3107_s23, %s3857_s23   ;;  %s3002_s22 = sphi %s3105_s22, %s3856_s22   ;;  %s2998_s21 = sphi %s3103_s21, %s3855_s21  }
   0x9   : > { %3809 = sst [smem:[#allocation24_spill]] %s3006_s23  ;;  %s3125_s26 = sadd.s32 1, %s3010_s24  }
   0xa   : > { %3810 = sst [smem:[#allocation25_spill]] %s3122_s25  ;;  %s71_s27 = ssub.s32 %s3010_s24, %s3125_s26 }
   0xb   : > { %3811 = sst [smem:[#allocation26_spill]] %s3125_s26  ;;  %s74_s28 = sadd.s32 1, %s3006_s23 }
   0xc   : > { %p72_p0 = scmp.eq.s32.totalorder %s71_s27, 0  ;;  %p81_p1 = scmp.ne.s32.totalorder %s3006_s23, %s3002_s22 }
   0xd   : > { %p82_p2 = scmp.eq.s32.totalorder %s3010_s24, 0  ;;  %p87_p3 = scmp.ne.s32.totalorder %s3002_s22, %s2998_s21 }
   0xe   : > { %s3135_s29 = scalar_select %p72_p0, %s3006_s23, %s74_s28  }
   0xf   : > { %p3137_p4 = por %p82_p2, %p81_p1  ;;  %p3780_p5 = scmp.eq.s32.totalorder %s3122_s25, 0 }
  0x10   : > { %3812 = sst [smem:[#allocation27_spill]] %s3135_s29  ;;  %p2109_p6 = scmp.ge.s32.totalorder %s3010_s24, 1 }
  0x11   : > { %p353_p7 = scmp.lt.s32.totalorder %s3010_s24, 5  ;;  %p3146_p8 = por %p3780_p5, %p87_p3 }
  0x12   : > { %s3012_s15 = smov [#allocation3]   ;;  %p2425_p13 = scmp.lt.s32.totalorder %s3010_s24, 4 }
  0x13   : > { %s3814_s13 = scalar_select %p3146_p8, 1, 0 }
  0x14   : > { %p3151_p10 = pnand %p2109_p6, %p353_p7  ;;  %s365_s16 = sshll.u32 %s3012_s15, 4  ;;  %s366_s16 = int_to_ptr.vmem [resolvable:$true] %s365_s16 }
  0x15   : > { %3815 = sst [smem:[#allocation28_spill]] %s3814_s13  ;;  %s3165_s18 = sand.u32 1, %s3006_s23  }
  0x16   : > { %s3816_s14 = scalar_select %p3151_p10, 1, 0 }
  0x17   : > { %p2385_p11 = pneg %p3151_p10  ;;  %s392_s19 = sand.u32 1, %s3010_s24  }
  0x18   : > { %3817 = sst [smem:[#allocation29_spill]] %s3816_s14  ;;  %p3170_p0 = pnand %p2425_p13, %p3137_p4 }
  0x19   : > { %p3159_p12 = pnand %p2385_p11, %p3780_p5  ;;  %s3820_s0 = sld [smem:[#allocation30_spill]] }
  0x1a   : > { %s3819_s20 = scalar_select %p3170_p0, 1, 0 }
  0x1b   : > { %s3818_s17 = scalar_select %p3159_p12, 1, 0 }
  0x1c   : > { %p3792_p2 = pneg %p3159_p12 }
  0x1f   : > { %s2582_s28 = scalar_lea.hbm %s3820_s0, 256 }
  0x20   : > { %p2583_p1 = scmp.ne.s32.totalorder %s3820_s0, %s2582_s28  ;;  %p2589_p4 = scmp.lt.u32.totalorder %s2582_s28, %s3820_s0 }
  0x22   : > { %p2585_p3 = pnand %p3792_p2, %p2583_p1 }
  0x24   : > { %p2586_p6 = pneg %p2585_p3 }
  0x26   : > { %p2591_p7 = pnand %p2589_p4, %p2586_p6 }
  0x28   : > { %2594 = shalt.err (!%p2591_p7)
}
  0x29   : > { %s2595_s26 = scalar_lea.vmem %s366_s16, 256  ;;  %p2603_p5 = scmp.lt.s32.totalorder %s366_s16, %s366_s16 }
  0x2a   : > { %p2596_p11 = scmp.ne.s32.totalorder %s366_s16, %s2595_s26  ;;  %p2604_p8 = scmp.lt.s32.totalorder %s2595_s26, %s2595_s26 }
  0x2c   : > { %p2598_p13 = pnand %p2596_p11, %p3792_p2  ;;  %p2605_p10 = por %p2604_p8, %p2603_p5 }
  0x2e   : > { %p2599_p9 = pneg %p2598_p13 }
  0x30   : > { %p2606_p0 = pnand %p2605_p10, %p2599_p9 }
  0x32   : > { %2609 = shalt.err (!%p2606_p0)
}
  0x33   : > { %s3795_s29 = smov 128   ;;  %s3796_s23 = smov 8  }
  0x34   : > { %2388 = dma.hbm_to_vmem [thread:$0]  (!%p3159_p12), %s3820_s0, 256, %s366_s16, [#allocation4], %s3795_s29, %s3795_s29, %s3796_s23  }
  0x35   : > { %s2347_s28 = smul.u32 192, %s3165_s18  ;;  %s3821_s2 = sld [smem:[#allocation31_spill]] }
  0x36   : > { %s2348_s26 = smul.u32 3072, %s3010_s24  ;;  %s3209_s14 = scalar_lea.sflag [#allocation4], %s392_s19 }
  0x37   : > { %s2349_s15 = smul.u32 3, %s3165_s18  ;;  %s396_s22 = scalar_lea.vmem [#allocation8], %s2347_s28 }
  0x38   : > { %s403_s25 = sshll.u32 %s396_s22, 4  ;;  %p3822_p8 = scmp.ne.s32.totalorder %s3819_s20, 0  ;;  %s3207_s25 = int_to_ptr.vmem [resolvable:$true] %s403_s25 }
  0x3a   : > { %p3215_p9 = pneg %p3822_p8 }
  0x3b   : > { %s3205_s13 = scalar_lea.hbm %s3821_s2, %s2348_s26  ;;  %s2615_s28 = scalar_lea.hbm %s3821_s2, 12288 }
  0x3c   : > { %s2610_s21 = scalar_lea.hbm %s3205_s13, 3072  ;;  %p2616_p1 = scmp.lt.u32.totalorder %s3205_s13, %s3821_s2 }
  0x3d   : > { %p2611_p5 = scmp.ne.s32.totalorder %s3205_s13, %s2610_s21  ;;  %p2617_p3 = scmp.lt.u32.totalorder %s2615_s28, %s2610_s21 }
  0x3e   : > { %s3823_s16 = scalar_select %p3215_p9, 1, 0 }
  0x3f   : > { %p2613_p10 = pnand %p3215_p9, %p2611_p5  ;;  %p2618_p6 = por %p2617_p3, %p2616_p1 }
  0x40   : > { %p2619_p4 = scmp.lt.u32.totalorder %s2610_s21, %s3205_s13 }
  0x41   : > { %p2614_p0 = pneg %p2613_p10 }
  0x42   : > { %p2620_p7 = por %p2619_p4, %p2618_p6 }
  0x44   : > { %p2621_p11 = pnand %p2620_p7, %p2614_p0 }
  0x46   : > { %2624 = shalt.err (!%p2621_p11)
}
  0x47   : > { %s2625_s19 = scalar_lea.vmem %s3207_s25, 3072  ;;  %s3015_s30 = smov [#allocation8]  }
  0x48   : > { %p2626_p13 = scmp.ne.s32.totalorder %s3207_s25, %s2625_s19  ;;  %s2630_s12 = sshll.u32 %s3015_s30, 4  ;;  %s2631_s12 = int_to_ptr.vmem [resolvable:$false] %s2630_s12 }
  0x49   : > { %s2632_s27 = scalar_lea.vmem %s2631_s12, 6144  ;;  %p2633_p2 = scmp.lt.s32.totalorder %s3207_s25, %s2631_s12 }
  0x4a   : > { %p2628_p5 = pnand %p2626_p13, %p3215_p9  ;;  %p2634_p12 = scmp.lt.s32.totalorder %s2632_s27, %s2625_s19 }
  0x4c   : > { %p2629_p10 = pneg %p2628_p5  ;;  %p2635_p1 = por %p2634_p12, %p2633_p2 }
  0x4e   : > { %p2636_p3 = pnand %p2635_p1, %p2629_p10 }
  0x50   : > { %2639 = shalt.err (!%p2636_p3)
}
  0x51   : > { %s3016_s21 = smov 192   ;;  %s3017_s28 = smov 12  }
  0x52   : > { %2395 = dma.hbm_to_vmem [thread:$0]  (!%p3822_p8), %s3205_s13, 3072, %s3207_s25, %s3209_s14, %s3016_s21, %s3016_s21, %s3017_s28  }
  0x53   : > { %s2350_s22 = smul.u32 48, %s3010_s24  ;;  %s417_s26 = scalar_lea.vmem [#allocation9], %s2349_s15 }
  0x54   : > { %s425_s30 = sshll.u32 %s417_s26, 4  ;;  %s2115_s19 = sshll.u32 %s3165_s18, 6  ;;  %s3242_s30 = int_to_ptr.vmem [resolvable:$true] %s425_s30 }
  0x55   : > { %s423_s29 = scalar_lea.hbm %s3767_s3, %s2350_s22  ;;  %s2645_s25 = scalar_lea.hbm %s3767_s3, 192 }
  0x56   : > { %s2640_s23 = scalar_lea.hbm %s423_s29, 48  ;;  %p2646_p6 = scmp.lt.u32.totalorder %s423_s29, %s3767_s3 }
  0x57   : > { %p2641_p12 = scmp.ne.s32.totalorder %s423_s29, %s2640_s23  ;;  %p2647_p4 = scmp.lt.u32.totalorder %s2645_s25, %s2640_s23 }
  0x58   : > { %p2649_p11 = scmp.lt.u32.totalorder %s2640_s23, %s423_s29 }
  0x59   : > { %p2643_p2 = pnand %p2641_p12, %p3215_p9  ;;  %p2648_p7 = por %p2647_p4, %p2646_p6 }
  0x5b   : > { %p2644_p0 = pneg %p2643_p2  ;;  %p2650_p13 = por %p2649_p11, %p2648_p7 }
  0x5d   : > { %p2651_p5 = pnand %p2650_p13, %p2644_p0 }
  0x5f   : > { %2654 = shalt.err (!%p2651_p5)
}
  0x60   : > { %s2655_s15 = scalar_lea.vmem %s3242_s30, 48  ;;  %s3018_s0 = smov [#allocation9]  }
  0x61   : > { %p2656_p10 = scmp.ne.s32.totalorder %s3242_s30, %s2655_s15  ;;  %s2660_s2 = sshll.u32 %s3018_s0, 4  ;;  %s2661_s2 = int_to_ptr.vmem [resolvable:$false] %s2660_s2 }
  0x62   : > { %s2662_s28 = scalar_lea.vmem %s2661_s2, 96  ;;  %p2663_p12 = scmp.lt.s32.totalorder %s3242_s30, %s2661_s2 }
  0x63   : > { %p2658_p1 = pnand %p2656_p10, %p3215_p9  ;;  %p2664_p2 = scmp.lt.s32.totalorder %s2662_s28, %s2655_s15 }
  0x65   : > { %p2659_p3 = pneg %p2658_p1  ;;  %p2665_p6 = por %p2664_p2, %p2663_p12 }
  0x67   : > { %p2666_p4 = pnand %p2665_p6, %p2659_p3 }
  0x69   : > { %2669 = shalt.err (!%p2666_p4)
}
  0x6a   : > { %2398 = dma.hbm_to_vmem [thread:$0]  (!%p3822_p8), %s423_s29, 48, %s3242_s30, %s3209_s14  }
  0x6b   : > { %s2225_s23 = sshll.u32 %s3010_s24, 10  ;;  %s436_s22 = scalar_lea.vmem [#allocation10], %s2115_s19 }
  0x6c   : > { %s443_s26 = sshll.u32 %s436_s22, 4  ;;  %s3271_s25 = scalar_lea.hbm %s3768_s4, %s2225_s23  ;;  %s3273_s26 = int_to_ptr.vmem [resolvable:$true] %s443_s26 }
  0x6d   : > { %s2670_s13 = scalar_lea.hbm %s3271_s25, 1024  ;;  %s2675_s19 = scalar_lea.hbm %s3768_s4, 4096 }
  0x6e   : > { %p2671_p0 = scmp.ne.s32.totalorder %s3271_s25, %s2670_s13  ;;  %p2676_p13 = scmp.lt.u32.totalorder %s3271_s25, %s3768_s4 }
  0x6f   : > { %p2677_p5 = scmp.lt.u32.totalorder %s2675_s19, %s2670_s13  ;;  %p2679_p1 = scmp.lt.u32.totalorder %s2670_s13, %s3271_s25 }
  0x70   : > { %p2673_p7 = pnand %p2671_p0, %p3215_p9 }
  0x71   : > { %p2678_p10 = por %p2677_p5, %p2676_p13 }
  0x72   : > { %p2674_p11 = pneg %p2673_p7 }
  0x73   : > { %p2680_p3 = por %p2679_p1, %p2678_p10 }
  0x75   : > { %p2681_p12 = pnand %p2680_p3, %p2674_p11 }
  0x77   : > { %2684 = shalt.err (!%p2681_p12)
}
  0x78   : > { %s2685_s0 = scalar_lea.vmem %s3273_s26, 1024  ;;  %s3019_s2 = smov [#allocation10]  }
  0x79   : > { %p2686_p2 = scmp.ne.s32.totalorder %s3273_s26, %s2685_s0  ;;  %s2690_s28 = sshll.u32 %s3019_s2, 4  ;;  %s2691_s28 = int_to_ptr.vmem [resolvable:$false] %s2690_s28 }
  0x7a   : > { %s2692_s23 = scalar_lea.vmem %s2691_s28, 2048  ;;  %p2693_p0 = scmp.lt.s32.totalorder %s3273_s26, %s2691_s28 }
  0x7b   : > { %p2688_p6 = pnand %p2686_p2, %p3215_p9  ;;  %p2694_p7 = scmp.lt.s32.totalorder %s2692_s23, %s2685_s0 }
  0x7d   : > { %p2689_p4 = pneg %p2688_p6  ;;  %p2695_p13 = por %p2694_p7, %p2693_p0 }
  0x7f   : > { %p2696_p5 = pnand %p2695_p13, %p2689_p4 }
  0x81   : > { %2699 = shalt.err (!%p2696_p5)
}
  0x82   : > { %s3799_s22 = smov 64   ;;  %s3800_s12 = smov 4  }
  0x83   : > { %2401 = dma.hbm_to_vmem [thread:$0]  (!%p3822_p8), %s3271_s25, 1024, %s3273_s26, %s3209_s14, %s3799_s22, %s3799_s22, %s3800_s12  }
  0x84   : > { %s3798_s27 = sshll.u32 %s3010_s24, 4  ;;  %s456_s19 = scalar_lea.vmem [#allocation11], %s3165_s18 }
  0x85   : > { %s3306_s30 = scalar_lea.hbm %s3769_s5, %s3798_s27  ;;  %s463_s21 = sshll.u32 %s456_s19, 4  ;;  %s464_s21 = int_to_ptr.vmem [resolvable:$true] %s463_s21 }
  0x86   : > { %s2119_s15 = sshll.u32 %s3165_s18, 7  ;;  %s2700_s0 = scalar_lea.hbm %s3306_s30, 16 }
  0x87   : > { %p2701_p11 = scmp.ne.s32.totalorder %s3306_s30, %s2700_s0  ;;  %s2705_s2 = scalar_lea.hbm %s3769_s5, 64 }
  0x88   : > { %p2706_p3 = scmp.lt.u32.totalorder %s3306_s30, %s3769_s5  ;;  %p2707_p12 = scmp.lt.u32.totalorder %s2705_s2, %s2700_s0 }
  0x89   : > { %p2703_p10 = pnand %p2701_p11, %p3215_p9  ;;  %p2709_p6 = scmp.lt.u32.totalorder %s2700_s0, %s3306_s30 }
  0x8a   : > { %p2708_p2 = por %p2707_p12, %p2706_p3 }
  0x8b   : > { %p2704_p1 = pneg %p2703_p10 }
  0x8c   : > { %p2710_p4 = por %p2709_p6, %p2708_p2 }
  0x8e   : > { %p2711_p0 = pnand %p2710_p4, %p2704_p1 }
  0x90   : > { %2714 = shalt.err (!%p2711_p0)
}
  0x91   : > { %s2715_s13 = scalar_lea.vmem %s464_s21, 16  ;;  %s3022_s29 = smov [#allocation11]  }
  0x92   : > { %p2716_p7 = scmp.ne.s32.totalorder %s464_s21, %s2715_s13  ;;  %s2720_s19 = sshll.u32 %s3022_s29, 4  ;;  %s2721_s19 = int_to_ptr.vmem [resolvable:$false] %s2720_s19 }
  0x93   : > { %s2722_s26 = scalar_lea.vmem %s2721_s19, 32  ;;  %p2723_p11 = scmp.lt.s32.totalorder %s464_s21, %s2721_s19 }
  0x94   : > { %p2718_p13 = pnand %p2716_p7, %p3215_p9  ;;  %p2724_p10 = scmp.lt.s32.totalorder %s2722_s26, %s2715_s13 }
  0x96   : > { %p2719_p5 = pneg %p2718_p13  ;;  %p2725_p8 = por %p2724_p10, %p2723_p11 }
  0x98   : > { %p2726_p3 = pnand %p2725_p8, %p2719_p5 }
  0x9a   : > { %2729 = shalt.err (!%p2726_p3)
}
  0x9b   : > { %p3824_p12 = scmp.ne.s32.totalorder %s3819_s20, 0  ;;  %s2226_s0 = sshll.u32 %s3010_s24, 11 }
  0x9c   : > { %s3334_s28 = scalar_lea.hbm %s3770_s6, %s2226_s0  ;;  %s474_s23 = scalar_lea.vmem [#allocation12], %s2119_s15 }
  0x9d   : > { %2404 = dma.hbm_to_vmem [thread:$0]  (!%p3824_p12), %s3306_s30, 16, %s464_s21, %s3209_s14  }
  0x9e   : > { %s481_s13 = sshll.u32 %s474_s23, 4  ;;  %s3341_s29 = sshll.u32 %s3165_s18, 1  ;;  %s3338_s13 = int_to_ptr.vmem [resolvable:$true] %s481_s13 }
  0x9f   : > { %s2730_s19 = scalar_lea.hbm %s3334_s28, 2048  ;;  %s2735_s26 = scalar_lea.hbm %s3770_s6, 8192 }
  0xa0   : > { %p2731_p8 = scmp.ne.s32.totalorder %s3334_s28, %s2730_s19  ;;  %p2736_p6 = scmp.lt.u32.totalorder %s3334_s28, %s3770_s6 }
  0xa1   : > { %p2737_p4 = scmp.lt.u32.totalorder %s2735_s26, %s2730_s19  ;;  %p2739_p7 = scmp.lt.u32.totalorder %s2730_s19, %s3334_s28 }
  0xa2   : > { %p2733_p1 = pnand %p2731_p8, %p3215_p9 }
  0xa3   : > { %p2738_p0 = por %p2737_p4, %p2736_p6 }
  0xa4   : > { %p2734_p2 = pneg %p2733_p1 }
  0xa5   : > { %p2740_p13 = por %p2739_p7, %p2738_p0 }
  0xa7   : > { %p2741_p5 = pnand %p2740_p13, %p2734_p2 }
  0xa9   : > { %2744 = shalt.err (!%p2741_p5)
}
  0xaa   : > { %s2745_s23 = scalar_lea.vmem %s3338_s13, 2048  ;;  %s3023_s30 = smov [#allocation12]  }
  0xab   : > { %p2746_p11 = scmp.ne.s32.totalorder %s3338_s13, %s2745_s23  ;;  %s2750_s21 = sshll.u32 %s3023_s30, 4  ;;  %s2751_s21 = int_to_ptr.vmem [resolvable:$false] %s2750_s21 }
  0xac   : > { %s2752_s25 = scalar_lea.vmem %s2751_s21, 4096  ;;  %p2753_p8 = scmp.lt.s32.totalorder %s3338_s13, %s2751_s21 }
  0xad   : > { %p2748_p10 = pnand %p2746_p11, %p3215_p9  ;;  %p2754_p1 = scmp.lt.s32.totalorder %s2752_s25, %s2745_s23 }
  0xaf   : > { %p2749_p3 = pneg %p2748_p10  ;;  %p2755_p6 = por %p2754_p1, %p2753_p8 }
  0xb1   : > { %p2756_p4 = pnand %p2755_p6, %p2749_p3 }
  0xb3   : > { %2759 = shalt.err (!%p2756_p4)
}
  0xb4   : > { %s3825_s19 = smov 8   ;;  %s3826_s26 = smov 128  }
  0xb5   : > { %2407 = dma.hbm_to_vmem [thread:$0]  (!%p3824_p12), %s3334_s28, 2048, %s3338_s13, %s3209_s14, %s3826_s26, %s3826_s26, %s3825_s19  }
  0xb6   : > { %s3369_s2 = sshll.u32 %s3010_s24, 5  ;;  %s495_s25 = scalar_lea.vmem [#allocation13], %s3341_s29 }
  0xb7   : > { %s3375_s21 = scalar_lea.hbm %s3771_s7, %s3369_s2  ;;  %s503_s27 = sshll.u32 %s495_s25, 4  ;;  %s504_s27 = int_to_ptr.vmem [resolvable:$true] %s503_s27 }
  0xb8   : > { %s2760_s22 = scalar_lea.hbm %s3375_s21, 32  ;;  %s2765_s19 = scalar_lea.hbm %s3771_s7, 128 }
  0xb9   : > { %p2761_p2 = scmp.ne.s32.totalorder %s3375_s21, %s2760_s22  ;;  %p2766_p13 = scmp.lt.u32.totalorder %s3375_s21, %s3771_s7 }
  0xba   : > { %p2767_p5 = scmp.lt.u32.totalorder %s2765_s19, %s2760_s22  ;;  %p2769_p10 = scmp.lt.u32.totalorder %s2760_s22, %s3375_s21 }
  0xbb   : > { %p2763_p0 = pnand %p2761_p2, %p3215_p9 }
  0xbc   : > { %p2768_p11 = por %p2767_p5, %p2766_p13 }
  0xbd   : > { %p2764_p7 = pneg %p2763_p0 }
  0xbe   : > { %p2770_p3 = por %p2769_p10, %p2768_p11 }
  0xc0   : > { %p2771_p8 = pnand %p2770_p3, %p2764_p7 }
  0xc2   : > { %2774 = shalt.err (!%p2771_p8)
}
  0xc3   : > { %s2775_s23 = scalar_lea.vmem %s504_s27, 32  ;;  %s3024_s25 = smov [#allocation13]  }
  0xc4   : > { %p2776_p1 = scmp.ne.s32.totalorder %s504_s27, %s2775_s23  ;;  %s2780_s12 = sshll.u32 %s3024_s25, 4  ;;  %s2781_s12 = int_to_ptr.vmem [resolvable:$false] %s2780_s12 }
  0xc5   : > { %s2782_s28 = scalar_lea.vmem %s2781_s12, 64  ;;  %p2783_p2 = scmp.lt.s32.totalorder %s504_s27, %s2781_s12 }
  0xc6   : > { %p2778_p6 = pnand %p2776_p1, %p3215_p9  ;;  %p2784_p0 = scmp.lt.s32.totalorder %s2782_s28, %s2775_s23 }
  0xc8   : > { %p2779_p4 = pneg %p2778_p6  ;;  %p2785_p12 = por %p2784_p0, %p2783_p2 }
  0xca   : > { %p2786_p5 = pnand %p2785_p12, %p2779_p4 }
  0xcc   : > { %2789 = shalt.err (!%p2786_p5)
}
  0xcd   : > { %p3827_p13 = scmp.ne.s32.totalorder %s3819_s20, 0  ;;  %s3401_s19 = scalar_lea.hbm %s3772_s8, %s2226_s0 }
  0xce   : > { %s514_s12 = scalar_lea.vmem [#allocation14], %s2119_s15  ;;  %s2790_s30 = scalar_lea.hbm %s3401_s19, 2048 }
  0xcf   : > { %2410 = dma.hbm_to_vmem [thread:$0]  (!%p3827_p13), %s3375_s21, 32, %s504_s27, %s3209_s14  }
  0xd0   : > { %s521_s26 = sshll.u32 %s514_s12, 4  ;;  %p2791_p12 = scmp.ne.s32.totalorder %s3401_s19, %s2790_s30  ;;  %s3405_s26 = int_to_ptr.vmem [resolvable:$true] %s521_s26 }
  0xd1   : > { %s2795_s23 = scalar_lea.hbm %s3772_s8, 8192  ;;  %p2796_p10 = scmp.lt.u32.totalorder %s3401_s19, %s3772_s8 }
  0xd2   : > { %p2793_p7 = pnand %p2791_p12, %p3215_p9  ;;  %p2797_p3 = scmp.lt.u32.totalorder %s2795_s23, %s2790_s30 }
  0xd3   : > { %p2799_p1 = scmp.lt.u32.totalorder %s2790_s30, %s3401_s19 }
  0xd4   : > { %p2794_p11 = pneg %p2793_p7  ;;  %p2798_p8 = por %p2797_p3, %p2796_p10 }
  0xd6   : > { %p2800_p6 = por %p2799_p1, %p2798_p8 }
  0xd8   : > { %p2801_p4 = pnand %p2800_p6, %p2794_p11 }
  0xda   : > { %2804 = shalt.err (!%p2801_p4)
}
  0xdb   : > { %s2805_s15 = scalar_lea.vmem %s3405_s26, 2048  ;;  %s3025_s28 = smov [#allocation14]  }
  0xdc   : > { %p2806_p2 = scmp.ne.s32.totalorder %s3405_s26, %s2805_s15  ;;  %s2810_s22 = sshll.u32 %s3025_s28, 4  ;;  %s2811_s22 = int_to_ptr.vmem [resolvable:$false] %s2810_s22 }
  0xdd   : > { %s2812_s13 = scalar_lea.vmem %s2811_s22, 4096  ;;  %p2813_p12 = scmp.lt.s32.totalorder %s3405_s26, %s2811_s22 }
  0xde   : > { %p2808_p0 = pnand %p2806_p2, %p3215_p9  ;;  %p2814_p7 = scmp.lt.s32.totalorder %s2812_s13, %s2805_s15 }
  0xe0   : > { %p2809_p5 = pneg %p2808_p0  ;;  %p2815_p10 = por %p2814_p7, %p2813_p12 }
  0xe2   : > { %p2816_p3 = pnand %p2815_p10, %p2809_p5 }
  0xe4   : > { %2819 = shalt.err (!%p2816_p3)
}
  0xe5   : > { %s3828_s12 = smov 4   ;;  %s3829_s30 = smov 64  }
  0xe6   : > { %2413 = dma.hbm_to_vmem [thread:$0]  (!%p3827_p13), %s3401_s19, 2048, %s3405_s26, %s3209_s14, %s3829_s30, %s3829_s30, %s3828_s12  }
  0xe7   : > { %s3830_s27 = sshll.u32 %s3010_s24, 4  ;;  %s534_s25 = scalar_lea.vmem [#allocation15], %s3165_s18 }
  0xe8   : > { %s3437_s0 = scalar_lea.hbm %s3773_s9, %s3830_s27  ;;  %s541_s15 = sshll.u32 %s534_s25, 4  ;;  %s542_s15 = int_to_ptr.vmem [resolvable:$true] %s541_s15 }
  0xe9   : > { %s2820_s28 = scalar_lea.hbm %s3437_s0, 16  ;;  %s2825_s24 = scalar_lea.hbm %s3773_s9, 64 }
  0xea   : > { %p2821_p11 = scmp.ne.s32.totalorder %s3437_s0, %s2820_s28  ;;  %p2826_p6 = scmp.lt.u32.totalorder %s3437_s0, %s3773_s9 }
  0xeb   : > { %p2827_p4 = scmp.lt.u32.totalorder %s2825_s24, %s2820_s28  ;;  %p2829_p0 = scmp.lt.u32.totalorder %s2820_s28, %s3437_s0 }
  0xec   : > { %p2823_p8 = pnand %p2821_p11, %p3215_p9 }
  0xed   : > { %p2828_p2 = por %p2827_p4, %p2826_p6 }
  0xee   : > { %p2824_p1 = pneg %p2823_p8 }
  0xef   : > { %p2830_p5 = por %p2829_p0, %p2828_p2 }
  0xf1   : > { %p2831_p12 = pnand %p2830_p5, %p2824_p1 }
  0xf3   : > { %2834 = shalt.err (!%p2831_p12)
}
  0xf4   : > { %s2835_s18 = scalar_lea.vmem %s542_s15, 16  ;;  %s3026_s12 = smov [#allocation15]  }
  0xf5   : > { %p2836_p7 = scmp.ne.s32.totalorder %s542_s15, %s2835_s18  ;;  %s2840_s30 = sshll.u32 %s3026_s12, 4  ;;  %s2841_s30 = int_to_ptr.vmem [resolvable:$false] %s2840_s30 }
  0xf6   : > { %s2842_s27 = scalar_lea.vmem %s2841_s30, 32  ;;  %p2843_p11 = scmp.lt.s32.totalorder %s542_s15, %s2841_s30 }
  0xf7   : > { %p2838_p10 = pnand %p2836_p7, %p3215_p9  ;;  %p2844_p8 = scmp.lt.s32.totalorder %s2842_s27, %s2835_s18 }
  0xf9   : > { %p2839_p3 = pneg %p2838_p10  ;;  %p2845_p13 = por %p2844_p8, %p2843_p11 }
  0xfb   : > { %p2846_p4 = pnand %p2845_p13, %p2839_p3 }
  0xfd   : > { %2849 = shalt.err (!%p2846_p4)
}
  0xfe   : > { %p3831_p6 = scmp.ne.s32.totalorder %s3819_s20, 0  ;;  %s3462_s25 = scalar_lea.hbm %s3774_s10, %s3369_s2 }
  0xff   : > { %s552_s28 = scalar_lea.vmem [#allocation16], %s3341_s29  ;;  %s2850_s19 = scalar_lea.hbm %s3462_s25, 32 }
 0x100   : > { %2416 = dma.hbm_to_vmem [thread:$0]  (!%p3831_p6), %s3437_s0, 16, %s542_s15, %s3209_s14  }
 0x101   : > { %s559_s22 = sshll.u32 %s552_s28, 4  ;;  %p2851_p13 = scmp.ne.s32.totalorder %s3462_s25, %s2850_s19  ;;  %s560_s22 = int_to_ptr.vmem [resolvable:$true] %s559_s22 }
 0x102   : > { %s2855_s0 = scalar_lea.hbm %s3774_s10, 128  ;;  %p2856_p0 = scmp.lt.u32.totalorder %s3462_s25, %s3774_s10 }
 0x103   : > { %p2853_p1 = pnand %p2851_p13, %p3215_p9  ;;  %p2857_p5 = scmp.lt.u32.totalorder %s2855_s0, %s2850_s19 }
 0x104   : > { %p2859_p7 = scmp.lt.u32.totalorder %s2850_s19, %s3462_s25 }
 0x105   : > { %p2854_p2 = pneg %p2853_p1  ;;  %p2858_p12 = por %p2857_p5, %p2856_p0 }
 0x107   : > { %p2860_p10 = por %p2859_p7, %p2858_p12 }
 0x109   : > { %p2861_p3 = pnand %p2860_p10, %p2854_p2 }
 0x10b   : > { %2864 = shalt.err (!%p2861_p3)
}
 0x10c   : > { %s2865_s18 = scalar_lea.vmem %s560_s22, 32  ;;  %s3027_s12 = smov [#allocation16]  }
 0x10d   : > { %p2866_p11 = scmp.ne.s32.totalorder %s560_s22, %s2865_s18  ;;  %s2870_s30 = sshll.u32 %s3027_s12, 4  ;;  %s2871_s30 = int_to_ptr.vmem [resolvable:$false] %s2870_s30 }
 0x10e   : > { %s2872_s27 = scalar_lea.vmem %s2871_s30, 64  ;;  %p2873_p13 = scmp.lt.s32.totalorder %s560_s22, %s2871_s30 }
 0x10f   : > { %p2868_p8 = pnand %p2866_p11, %p3215_p9  ;;  %p2874_p1 = scmp.lt.s32.totalorder %s2872_s27, %s2865_s18 }
 0x111   : > { %p2869_p4 = pneg %p2868_p8  ;;  %p2875_p6 = por %p2874_p1, %p2873_p13 }
 0x113   : > { %p2876_p0 = pnand %p2875_p6, %p2869_p4 }
 0x115   : > { %2879 = shalt.err (!%p2876_p0)
}
 0x116   : > { %p3832_p5 = scmp.ne.s32.totalorder %s3819_s20, 0  ;;  %s3028_s21 = smov [#allocation6]  }
 0x117   : > { %s378_s23 = sshll.u32 %s3028_s21, 4  ;;  %s2880_s24 = scalar_lea.hbm %s3765_s1, 32  ;;  %s379_s23 = int_to_ptr.vmem [resolvable:$true] %s378_s23 }
 0x118   : > { %2419 = dma.hbm_to_vmem [thread:$0]  (!%p3832_p5), %s3462_s25, 32, %s560_s22, %s3209_s14  }
 0x119   : > { %p2881_p2 = scmp.ne.s32.totalorder %s3765_s1, %s2880_s24  ;;  %p3833_p12 = scmp.ne.s32.totalorder %s3818_s17, 0 }
 0x11a   : > { %p2887_p3 = scmp.lt.u32.totalorder %s2880_s24, %s3765_s1 }
 0x11b   : > { %p3834_p6 = pneg %p3833_p12 }
 0x11d   : > { %p2883_p7 = pnand %p2881_p2, %p3834_p6 }
 0x11f   : > { %p2884_p10 = pneg %p2883_p7 }
 0x121   : > { %p2889_p11 = pnand %p2887_p3, %p2884_p10 }
 0x123   : > { %2892 = shalt.err (!%p2889_p11)
}
 0x124   : > { %s2893_s25 = scalar_lea.vmem %s379_s23, 32  ;;  %p3835_p4 = pmov %p3834_p6 }
 0x125   : > { %p2894_p8 = scmp.ne.s32.totalorder %s379_s23, %s2893_s25  ;;  %p2901_p0 = scmp.lt.s32.totalorder %s379_s23, %s379_s23 }
 0x126   : > { %p2902_p5 = scmp.lt.s32.totalorder %s2893_s25, %s2893_s25 }
 0x127   : > { %p2896_p13 = pnand %p2894_p8, %p3835_p4 }
 0x128   : > { %p2903_p9 = por %p2902_p5, %p2901_p0 }
 0x129   : > { %p2897_p1 = pneg %p2896_p13 }
 0x12b   : > { %p2904_p2 = pnand %p2903_p9, %p2897_p1 }
 0x12d   : > { %2907 = shalt.err (!%p2904_p2)
}
 0x12e   : > { %s3029_s22 = smov 16   ;;  %s3030_s18 = smov 1  }
 0x12f   : > { %2391 = dma.hbm_to_vmem [thread:$0]  (!%p3833_p12), %s3765_s1, 32, %s379_s23, [#allocation7], %s3029_s22, %s3029_s22, %s3030_s18  }
 0x130   : > { %s3507_s28 = scalar_lea.hbm %s3775_s11, %s3369_s2  ;;  %s570_s19 = scalar_lea.vmem [#allocation17], %s3341_s29 }
 0x131   : > { %s577_s24 = sshll.u32 %s570_s19, 4  ;;  %s2908_s26 = scalar_lea.hbm %s3507_s28, 32  ;;  %s578_s24 = int_to_ptr.vmem [resolvable:$true] %s577_s24 }
 0x132   : > { %p2909_p9 = scmp.ne.s32.totalorder %s3507_s28, %s2908_s26  ;;  %p3836_p5 = scmp.ne.s32.totalorder %s3823_s16, 0 }
 0x133   : > { %s2913_s23 = scalar_lea.hbm %s3775_s11, 128  ;;  %p2914_p12 = scmp.lt.u32.totalorder %s3507_s28, %s3775_s11 }
 0x134   : > { %p2911_p6 = pnand %p2909_p9, %p3836_p5  ;;  %p2915_p10 = scmp.lt.u32.totalorder %s2913_s23, %s2908_s26 }
 0x135   : > { %p2917_p11 = scmp.lt.u32.totalorder %s2908_s26, %s3507_s28 }
 0x136   : > { %p2912_p7 = pneg %p2911_p6  ;;  %p2916_p3 = por %p2915_p10, %p2914_p12 }
 0x138   : > { %p2918_p8 = por %p2917_p11, %p2916_p3 }
 0x13a   : > { %p2919_p4 = pnand %p2918_p8, %p2912_p7 }
 0x13c   : > { %2922 = shalt.err (!%p2919_p4)
}
 0x13d   : > { %s2923_s29 = scalar_lea.vmem %s578_s24, 32  ;;  %s3031_s2 = smov [#allocation17]  }
 0x13e   : > { %p2924_p13 = scmp.ne.s32.totalorder %s578_s24, %s2923_s29  ;;  %s2928_s25 = sshll.u32 %s3031_s2, 4  ;;  %s2929_s25 = int_to_ptr.vmem [resolvable:$false] %s2928_s25 }
 0x13f   : > { %s2930_s22 = scalar_lea.vmem %s2929_s25, 64  ;;  %p2931_p2 = scmp.lt.s32.totalorder %s578_s24, %s2929_s25 }
 0x140   : > { %p2926_p1 = pnand %p2924_p13, %p3836_p5  ;;  %p2932_p9 = scmp.lt.s32.totalorder %s2930_s22, %s2923_s29 }
 0x142   : > { %p2927_p0 = pneg %p2926_p1  ;;  %p2933_p6 = por %p2932_p9, %p2931_p2 }
 0x144   : > { %p2934_p10 = pnand %p2933_p6, %p2927_p0 }
 0x146   : > { %2937 = shalt.err (!%p2934_p10)
}
 0x147   : > { %p3837_p12 = scmp.ne.s32.totalorder %s3819_s20, 0  ;;  %s3838_s18 = sld [smem:[#allocation29_spill]] }
 0x149   : > { %2422 = dma.hbm_to_vmem [thread:$0]  (!%p3837_p12), %s3507_s28, 32, %s578_s24, %s3209_s14  }
 0x14d   : > { %p3839_p7 = scmp.ne.s32.totalorder %s3838_s18, 0 }
 0x14e   : > { %s3840_s16 = sld [smem:[#allocation25_spill]] (!%p3839_p7) }
 0x14f   : > { %586 = sbr.rel (%p3839_p7) target bundleno = 2466 (0x9a2), region = 68 }
 0x154   : > { %p3841_p5 = scmp.eq.s32.totalorder (!%p3839_p7), %s3840_s16, 0 }
 0x156   : > { %2981 = dma.done.wait (%p3841_p5), [#allocation4], 256   ;;  %p3842_p3 = pmov %p3841_p5 }
 0x158   : > { %2983 = vsyncadd (%p3842_p3), [#allocation4], 4294967040  ;;  %p3843_p11 = pmov %p3842_p3 }
 0x159   : > { %p3844_p8 = pmov %p3842_p3 }
 0x15a   : > { %2985 = dma.done.wait (%p3843_p11), [#allocation7], 32  }
 0x15b   : > { %2987 = vsyncadd (%p3844_p8), [#allocation7], 4294967264  ;;  %s3845_s20 = sld [smem:[#allocation23_spill]]  ;;  %s3846_s12 = sld [smem:[#allocation28_spill]] }
 0x15c   : > { %s596_s30 = sand.u32 1, %s3840_s16  }
 0x15d   : > { %s597_s21 = scalar_lea.sflag [#allocation4], %s596_s30 }
 0x161   : > { %s3540_s14 = sand.u32 1, %s3845_s20   ;;  %p3847_p4 = scmp.ne.s32.totalorder %s3846_s12, 0 }
 0x162   : > { %s2351_s27 = smul.u32 192, %s3540_s14 }
 0x164   : > { %s3543_s28 = scalar_lea.vmem [#allocation8], %s2351_s27 }
 0x165   : > { %2989 = dma.done.wait (%p3847_p4), %s597_s21, 8368  }
 0x166   : > { %2991 = vsyncadd (%p3847_p4), %s597_s21, 4294958928  ;;  %s2352_s19 = smul.u32 3, %s3540_s14  ;;  %s2136_s24 = sshll.u32 %s3540_s14, 6 }
 0x167   : > { %s2137_s26 = sshll.u32 %s3540_s14, 7  ;;  %s3553_s17 = sshll.u32 %s3540_s14, 1 }
 0x168   : > { %s3555_s0 = scalar_lea.vmem [#allocation9], %s2352_s19  ;;  %s3557_s23 = scalar_lea.vmem [#allocation10], %s2136_s24 }
 0x169   : > { %s626_s15 = scalar_lea.vmem [#allocation11], %s3540_s14  ;;  %s3560_s13 = scalar_lea.vmem [#allocation12], %s2137_s26 }
 0x16a   : > { %s644_s29 = scalar_lea.vmem [#allocation13], %s3553_s17  ;;  %s3563_s2 = scalar_lea.vmem [#allocation14], %s2137_s26 }
 0x16b   : > { %s661_s25 = scalar_lea.vmem [#allocation15], %s3540_s14  ;;  %s670_s22 = scalar_lea.vmem [#allocation16], %s3553_s17 }
 0x16c   : > { %s679_s18 = scalar_lea.vmem [#allocation17], %s3553_s17  ;;  %p3848_p13 = scmp.ne.s32.totalorder %s3840_s16, 0 }
 0x16d   : > { %v763_v0 = vld [vmem:[#allocation3] sm:$0xff] (!%p3848_p13)  ;;  %v764_v1 = vld [vmem:[#allocation3 + $0x8] sm:$0xff] (!%p3848_p13) }
 0x16e   : > { %762 = sbr.rel (%p3848_p13) target bundleno = 373 (0x175), region = 120  ;;  %765 = vst [vmem:[#allocation2] sm:$0xff] (!%p3848_p13), %v763_v0  ;;  %766 = vst [vmem:[#allocation2 + $0x8] sm:$0xff] (!%p3848_p13), %v764_v1 }
 0x175 PF: > { %v2478_v2 = vld [vmem:[%s3543_s28 + $0x4] ss:$12 sps:$4 sm:$0xff]   ;;  %v2480_v3 = vld [vmem:[%s3543_s28] ss:$12 sps:$4 sm:$0xff]   ;;  %v3032_v4 = vmov 0   ;;  %v3033_v5 = vmov 0.0   ;;  %v804_v31 = vlaneseq }
 0x176   : > { %979 = vmatprep.mubr.bf16.mxu0 %v3032_v4  ;;  %2283 = vmatprep.subr.bf16.mxu1 %v3033_v5  ;;  %v2481_v6 = vld [vmem:[%s3543_s28 + $0x1c] ss:$12 sps:$4 sm:$0xff]   ;;  %v2483_v7 = vld [vmem:[%s3543_s28 + $0x18] ss:$12 sps:$4 sm:$0xff]   ;;  %v2484_v8 = vld [vmem:[%s3543_s28 + $0x34] ss:$12 sps:$4 sm:$0xff]  }
 0x177   : > { %947 = vmatprep.subr.bf16.mxu0 %v2478_v2  ;;  %v2486_v9 = vld [vmem:[%s3543_s28 + $0x30] ss:$12 sps:$4 sm:$0xff]   ;;  %v2487_v10 = vld [vmem:[%s3543_s28 + $0x4c] ss:$12 sps:$4 sm:$0xff]   ;;  %v2489_v11 = vld [vmem:[%s3543_s28 + $0x48] ss:$12 sps:$4 sm:$0xff]  }
 0x178   : > { %948 = vmatpush1.bf16.msra.mxu0 %v2480_v3  ;;  %v2490_v12 = vld [vmem:[%s3543_s28 + $0x64] ss:$12 sps:$4 sm:$0xff]   ;;  %v2502_v13 = vld [vmem:[%s3543_s28 + $0x8] ss:$12 sps:$4 sm:$0xff]   ;;  %v2503_v14 = vld [vmem:[%s3543_s28 + $0x20] ss:$12 sps:$4 sm:$0xff]  }
 0x179   : > { %949 = vmatprep.subr.bf16.mxu0 %v2481_v6  ;;  %2284 = vmatpush3.bf16.msra.mxu1 %v2502_v13  ;;  %v2492_v15 = vld [vmem:[%s3543_s28 + $0x60] ss:$12 sps:$4 sm:$0xff]   ;;  %v2493_v16 = vld [vmem:[%s3543_s28 + $0x7c] ss:$12 sps:$4 sm:$0xff]   ;;  %v2504_v17 = vld [vmem:[%s3543_s28 + $0x38] ss:$12 sps:$4 sm:$0xff]  }
 0x17a   : > { %2285 = vmatprep.subr.bf16.mxu1 %v3033_v5  ;;  %v2495_v18 = vld [vmem:[%s3543_s28 + $0x78] ss:$12 sps:$4 sm:$0xff]   ;;  %v2496_v19 = vld [vmem:[%s3543_s28 + $0x94] ss:$12 sps:$4 sm:$0xff]   ;;  %v2505_v20 = vld [vmem:[%s3543_s28 + $0x50] ss:$12 sps:$4 sm:$0xff]  }
 0x17b   : > { %v2498_v21 = vld [vmem:[%s3543_s28 + $0x90] ss:$12 sps:$4 sm:$0xff]   ;;  %v2499_v22 = vld [vmem:[%s3543_s28 + $0xac] ss:$12 sps:$4 sm:$0xff]   ;;  %v2506_v23 = vld [vmem:[%s3543_s28 + $0x68] ss:$12 sps:$4 sm:$0xff]  }
 0x17c   : > { %950 = vmatpush1.bf16.msra.mxu0 %v2483_v7  ;;  %v2501_v24 = vld [vmem:[%s3543_s28 + $0xa8] ss:$12 sps:$4 sm:$0xff]   ;;  %v3596_v25 = vld [vmem:[#allocation2] sm:$0xff]  ;;  %vm3034_vm0 = vmmov 0   ;;  %v805_v32 = vshrl.u32 %v804_v31, 7  ;;  %vm1179_vm1 = vcmask 1043456  }
 0x17d   : > { %951 = vmatprep.subr.bf16.mxu0 %v2484_v8  ;;  %2286 = vmatpush3.bf16.msra.mxu1 %v2503_v14  ;;  %v3598_v26 = vld [vmem:[#allocation2 + $0x8] sm:$0xff]  ;;  %v2509_v30 = vld [vmem:[%s3543_s28 + $0xb0] ss:$12 sps:$4 sm:$0xff]   ;;  %v802_v34 = vld [vmem:[%s3555_s0] sm:$0x7]  ;;  %vm1151_vm2 = vcmask 64512  }
 0x17e   : > { %2287 = vmatprep.subr.bf16.mxu1 %v3033_v5  ;;  %v2507_v27 = vld [vmem:[%s3543_s28 + $0x80] ss:$12 sps:$4 sm:$0xff]   ;;  %v769_v28 = vpack.c.bf16 %v3598_v26, %v3596_v25  ;;  %v2508_v29 = vld [vmem:[%s3543_s28 + $0x98] ss:$12 sps:$4 sm:$0xff]   ;;  %2299 = vmatprep.mubr.msk.bf16.mxu1 %vm3034_vm0, %v3033_v5  ;;  %v3617_v33 = vsub.s32 1, %v805_v32  ;;  %v3621_v36 = vsub.s32 0, %v805_v32 }
 0x17f   : > { %v814_v50 = vsub.s32 2, %v805_v32  ;;  %v2173_v63 = vld [vmem:[#allocation6] ss:$0 sm:$0xff]  ;;  %v2514_v32 = vld [vmem:[%s3557_s23 + $0x20] sm:$0xff]   ;;  %s3849_s16 = sld [smem:[#allocation25_spill]] }
 0x180   : > { %952 = vmatpush1.bf16.msra.mxu0 %v2486_v9  ;;  %v811_v35 = vrot.slane %v802_v34, %v3617_v33  ;;  %v807_v41 = vrot.slane %v802_v34, %v3621_v36  ;;  %v2174_v9 = vld [vmem:[#allocation6 + $0x1] ss:$0 sm:$0xff] }
 0x181   : > { %953 = vmatprep.subr.bf16.mxu0 %v2487_v10  ;;  %2288 = vmatpush3.bf16.msra.mxu1 %v2504_v17  ;;  %v815_v51 = vrot.slane %v802_v34, %v814_v50  ;;  %v2513_v31 = vld [vmem:[%s3557_s23 + $0x18] sm:$0xff]  }
 0x182   : > { %2289 = vmatprep.subr.bf16.mxu1 %v3033_v5 }
 0x184   : > { %954 = vmatpush1.bf16.msra.mxu0 %v2489_v11 }
 0x185   : > { %955 = vmatprep.subr.bf16.mxu0 %v2490_v12  ;;  %2290 = vmatpush3.bf16.msra.mxu1 %v2505_v20  ;;  %p3850_p1 = scmp.ne.s32.totalorder %s3849_s16, 0 }
 0x186   : > { %2291 = vmatprep.subr.bf16.mxu1 %v3033_v5 }
 0x188   : > { %956 = vmatpush1.bf16.msra.mxu0 %v2492_v15 }
 0x189   : > { %957 = vmatprep.subr.bf16.mxu0 %v2493_v16  ;;  %2292 = vmatpush3.bf16.msra.mxu1 %v2506_v23 }
 0x18a   : > { %2293 = vmatprep.subr.bf16.mxu1 %v3033_v5 }
 0x18c   : > { %958 = vmatpush1.bf16.msra.mxu0 %v2495_v18 }
 0x18d   : > { %959 = vmatprep.subr.bf16.mxu0 %v2496_v19  ;;  %2294 = vmatpush3.bf16.msra.mxu1 %v2507_v27 }
 0x18e   : > { %2295 = vmatprep.subr.bf16.mxu1 %v3033_v5 }
 0x190   : > { %960 = vmatpush1.bf16.msra.mxu0 %v2498_v21 }
 0x191   : > { %961 = vmatprep.subr.bf16.mxu0 %v2499_v22  ;;  %2296 = vmatpush3.bf16.msra.mxu1 %v2508_v29  ;;  %v2511_v29 = vld [vmem:[%s3557_s23 + $0x8] sm:$0xff]  }
 0x192   : > { %2297 = vmatprep.subr.bf16.mxu1 %v3033_v5 }
 0x194   : > { %962 = vmatpush1.bf16.msra.mxu0 %v2501_v24 }
 0x195   : > { %2327 = vmatprep.subr.bf16.mxu0 %v3033_v5  ;;  %2298 = vmatpush3.bf16.msra.mxu1 %v2509_v30  ;;  %v2512_v30 = vld [vmem:[%s3557_s23 + $0x10] sm:$0xff]  }
 0x196   : > { %2303 = vmatprep.subr.bf16.mxu1 %v3033_v5 }
 0x197   : > { %980 = vmatmul.mubr.bf16.vlgmr.msra.gmra.mrb[0].mxu0 %v769_v28 }
 0x198   : > { %2343 = vmatprep.mubr.msk.bf16.mxu0 %vm3034_vm0, %v3033_v5  ;;  %2300 = vmatmul.mubr.bf16.vlgmr.msra.gmra.mrb[0].mxu1 %v769_v28  ;;  %v2510_v28 = vld [vmem:[%s3557_s23] sm:$0xff]  }
 0x199   : > { %2305 = vmatprep.mubr.msk.bf16.mxu1 %vm3034_vm0, %v3033_v5  ;;  %2328 = vmatpush3.bf16.msra.mxu0 %v2510_v28 }
 0x19a   : > { %2329 = vmatprep.subr.bf16.mxu0 %v3033_v5 }
 0x19d   : > { %2330 = vmatpush3.bf16.msra.mxu0 %v2511_v29 }
 0x19e   : > { %2331 = vmatprep.subr.bf16.mxu0 %v3033_v5 }
 0x1a1   : > { %2332 = vmatpush3.bf16.msra.mxu0 %v2512_v30 }
 0x1a2   : > { %2333 = vmatprep.subr.bf16.mxu0 %v3033_v5 }
 0x1a5   : > { %2334 = vmatpush3.bf16.msra.mxu0 %v2513_v31 }
 0x1a6   : > { %2335 = vmatprep.subr.bf16.mxu0 %v3033_v5 }
 0x1a9   : > { %2336 = vmatpush3.bf16.msra.mxu0 %v2514_v32 }
 0x1aa   : > { %2337 = vmatprep.subr.bf16.mxu0 %v3033_v5 }
 0x26a   : > { %v981_v37 = vpop.f32.mrb[0].mxu0 }
 0x26b   : > { %v983_v38 = vpop.f32.mrb[1].mxu0  ;;  %v982_v44 = vadd.f32 %v981_v37, %v807_v41  ;;  %v1024_v52 = vpop.f32.mrb[0].mxu1 }
 0x26c   : > { %v984_v39 = vadd.f32 %v983_v38, %v811_v35  ;;  %v985_v40 = vpop.f32.mrb[2].mxu0  ;;  %v1025_v53 = vadd.f32 %v1024_v52, %v815_v51  ;;  %v2301_v54 = vpop.f32.mrb[1].mxu1 }
 0x26d   : > { %v987_v42 = vpop.f32.mrb[3].mxu0  ;;  %v2229_v46 = vpack.c.bf16 %v982_v44, %v982_v44  ;;  %v986_v48 = vadd.f32 %v985_v40, %v807_v41  ;;  %v1027_v55 = vpop.f32.mrb[2].mxu1  ;;  %v2516_v44 = vld [vmem:[%s3557_s23 + $0x30] sm:$0xff]   ;;  %v2177_v54 = vld [vmem:[%s626_s15] ss:$0 sm:$0xff] }
 0x26e   : > { %v2231_v43 = vpack.c.bf16 %v984_v39, %v984_v39  ;;  %v988_v45 = vadd.f32 %v987_v42, %v811_v35  ;;  %v2233_v56 = vpack.c.bf16 %v1025_v53, %v1025_v53  ;;  %v1028_v57 = vadd.f32 %v1027_v55, %v815_v51  ;;  %v2302_v58 = vpop.f32.mrb[3].mxu1 }
 0x26f   : > { %v2230_v49 = vpack.c.bf16 %v986_v48, %v986_v48 }
 0x270   : > { %2304 = vmatpush3.bf16.xpose.msra.mxu1 %v2231_v43  ;;  %v2232_v47 = vpack.c.bf16 %v988_v45, %v988_v45  ;;  %v1181_v59 = vsel %vm1179_vm1, %v2233_v56, 0  ;;  %v2234_v60 = vpack.c.bf16 %v1028_v57, %v1028_v57  ;;  %v2515_v43 = vld [vmem:[%s3557_s23 + $0x28] sm:$0xff]   ;;  %v2517_v45 = vld [vmem:[%s3557_s23 + $0x38] sm:$0xff]  }
 0x271   : > { %2309 = vmatprep.subr.bf16.mxu1 %v3033_v5  ;;  %2338 = vmatpush3.bf16.msra.mxu0 %v2515_v43 }
 0x272   : > { %v1227_v61 = vsel %vm1179_vm1, %v2234_v60, 0  ;;  %2339 = vmatprep.subr.bf16.mxu0 %v3033_v5 }
 0x275   : > { %2340 = vmatpush3.bf16.msra.mxu0 %v2516_v44 }
 0x276   : > { %2341 = vmatprep.subr.bf16.mxu0 %v3033_v5 }
 0x277   : > { %2306 = vmatmul.mubr.bf16.vlgmr.msra.gmra.mrb[4].mxu1 %v2229_v46 }
 0x278   : > { %2310 = vmatpush3.bf16.xpose.msra.mxu1 %v2232_v47  ;;  %2311 = vmatprep.mubr.msk.bf16.mxu1 %vm3034_vm0, %v3033_v5 }
 0x279   : > { %2315 = vmatprep.subr.bf16.mxu1 %v3033_v5  ;;  %2342 = vmatpush3.bf16.msra.mxu0 %v2517_v45 }
 0x27f   : > { %2312 = vmatmul.mubr.bf16.vlgmr.msra.gmra.mrb[8].mxu1 %v2230_v49 }
 0x280   : > { %2317 = vmatprep.mubr.msk.bf16.mxu1 %vm3034_vm0, %v3033_v5  ;;  %2316 = vmatpush3.bf16.msra.mxu1 %v1181_v59 }
 0x281   : > { %2321 = vmatprep.subr.bf16.mxu1 %v3033_v5 }
 0x34a   : > { %v1087_v62 = vpop.f32.mrb[4].mxu1 }
 0x34b   : > { %v1133_v0 = vmul.f32 0.088388346, %v1087_v62  ;;  %v2307_v1 = vpop.f32.mrb[5].mxu1 }
 0x34c   : > { %v1090_v2 = vpop.f32.mrb[6].mxu1  ;;  %v2521_v1 = vld [vmem:[%s3560_s13 + $0x10] ss:$8 sps:$4 sm:$0xff]  }
 0x34d   : > { %v2308_v3 = vpop.f32.mrb[7].mxu1  ;;  %v1149_v6 = vadd.f32 %v2173_v63, %v1133_v0  ;;  %v2520_v63 = vld [vmem:[%s3560_s13 + $0x4] ss:$8 sps:$4 sm:$0xff]   ;;  %v2518_v0 = vld [vmem:[%s3560_s13] ss:$8 sps:$4 sm:$0xff]  }
 0x34e   : > { %v2526_v2 = vld [vmem:[%s3560_s13 + $0x24] ss:$8 sps:$4 sm:$0xff]   ;;  %v2524_v3 = vld [vmem:[%s3560_s13 + $0x20] ss:$8 sps:$4 sm:$0xff]  }
 0x34f   : > { %v1152_v7 = vsel %vm1151_vm2, %v1149_v6, -inf }
 0x350   : > { %1153 = vmax.xlane.f32.xlu0 %v1152_v7  ;;  %v2527_v7 = vld [vmem:[%s3560_s13 + $0x30] ss:$8 sps:$4 sm:$0xff]  }
 0x352   : > { %v1127_v8 = vpop.f32.mrb[8].mxu1 }
 0x353   : > { %v1134_v10 = vmul.f32 0.088388346, %v1127_v8  ;;  %v2313_v11 = vpop.f32.mrb[9].mxu1  ;;  %v2532_v8 = vld [vmem:[%s3560_s13 + $0x44] ss:$8 sps:$4 sm:$0xff]  }
 0x354   : > { %v1130_v12 = vpop.f32.mrb[10].mxu1  ;;  %v2533_v11 = vld [vmem:[%s3560_s13 + $0x50] ss:$8 sps:$4 sm:$0xff]  }
 0x355   : > { %v2314_v13 = vpop.f32.mrb[11].mxu1  ;;  %v1150_v14 = vadd.f32 %v2174_v9, %v1134_v10  ;;  %v2530_v9 = vld [vmem:[%s3560_s13 + $0x40] ss:$8 sps:$4 sm:$0xff]   ;;  %v2535_v10 = vld [vmem:[%s3560_s13 + $0x54] ss:$8 sps:$4 sm:$0xff]  }
 0x356   : > { %v2538_v12 = vld [vmem:[%s3560_s13 + $0x64] ss:$8 sps:$4 sm:$0xff]   ;;  %v2536_v13 = vld [vmem:[%s3560_s13 + $0x60] ss:$8 sps:$4 sm:$0xff]  }
 0x357   : > { %v1155_v15 = vsel %vm1151_vm2, %v1150_v14, -inf }
 0x358   : > { %1156 = vmax.xlane.f32.xlu0 %v1155_v15  ;;  %v2539_v15 = vld [vmem:[%s3560_s13 + $0x70] ss:$8 sps:$4 sm:$0xff]  }
 0x3dd   : > { %v1154_v16 = vpop.xlane.xlu0 %1153 }
 0x3de   : > { %v1158_v17 = vsub.f32 %v1149_v6, %v1154_v16  ;;  %v2529_v6 = vld [vmem:[%s3560_s13 + $0x34] ss:$8 sps:$4 sm:$0xff]  }
 0x3e0   : > { %v1160_v18 = vmul.f32 1.442695, %v1158_v17 }
 0x3e2   : > { %2558 = vpow2.f32 %v1160_v18 }
 0x3e5   : > { %v1157_v19 = vpop.xlane.xlu0 %1156 }
 0x3e6   : > { %v1159_v20 = vsub.f32 %v1150_v14, %v1157_v19  ;;  %v2541_v14 = vld [vmem:[%s3560_s13 + $0x74] ss:$8 sps:$4 sm:$0xff]  }
 0x3e8   : > { %v1162_v21 = vmul.f32 1.442695, %v1159_v20 }
 0x3ea   : > { %2560 = vpow2.f32 %v1162_v21 }
 0x3ec   : > { %v2559_v22 = vpop.eup %2558 }
 0x3ed   : > { %v1164_v23 = vsel %vm1151_vm2, %v2559_v22, 0.0 }
 0x3ee   : > { %1165 = vadd.xlane.f32.xlu1 %v1164_v23 }
 0x3f4   : > { %v2561_v24 = vpop.eup %2560 }
 0x3f5   : > { %v1167_v27 = vsel %vm1151_vm2, %v2561_v24, 0.0 }
 0x3f6   : > { %1168 = vadd.xlane.f32.xlu1 %v1167_v27 }
 0x47b   : > { %v1166_v34 = vpop.xlane.xlu1 %1165 }
 0x47c   : > { %2562 = vrcp.f32 %v1166_v34 }
 0x483   : > { %v1169_v35 = vpop.xlane.xlu1 %1168 }
 0x484   : > { %2564 = vrcp.f32 %v1169_v35  ;;  %v1382_v35 = vld [vmem:[%s670_s22] sm:$0x3] }
 0x485   : > { %v1423_v45 = vrot.slane %v1382_v35, %v3617_v33 }
 0x486   : > { %v2563_v37 = vpop.eup %2562 }
 0x487   : > { %v1172_v38 = vmul.f32 %v2563_v37, %v2559_v22 }
 0x489   : > { %v1174_v39 = vpack.c.bf16 %v1172_v38, %v1172_v38  ;;  %v1417_v38 = vrot.slane %v1382_v35, %v3621_v36 }
 0x48b   : > { %2318 = vmatmul.mubr.msk.bf16.vlgmr.msra.gmra.mrb[12].mxu1 %vm1151_vm2, %v1174_v39 }
 0x48c   : > { %2322 = vmatpush3.bf16.msra.mxu1 %v1227_v61  ;;  %2323 = vmatprep.mubr.msk.bf16.mxu1 %vm3034_vm0, %v3033_v5 }
 0x48d   : > { %1535 = vmatprep.subr.bf16.mxu1 %v2520_v63  ;;  %v1443_v63 = vld [vmem:[%s644_s29] sm:$0x3] }
 0x48e   : > { %v2565_v40 = vpop.eup %2564 }
 0x48f   : > { %v1173_v41 = vmul.f32 %v2565_v40, %v2561_v24 }
 0x491   : > { %v1175_v42 = vpack.c.bf16 %v1173_v41, %v1173_v41 }
 0x493   : > { %2324 = vmatmul.mubr.msk.bf16.vlgmr.msra.gmra.mrb[16].mxu1 %vm1151_vm2, %v1175_v42 }
 0x494   : > { %1567 = vmatprep.mubr.bf16.mxu1 %v3032_v4  ;;  %1536 = vmatpush1.bf16.msra.mxu1 %v2518_v0  ;;  %v1448_v0 = vrot.slane %v1443_v63, %v3621_v36 }
 0x55e   : > { %v1217_v46 = vpop.f32.mrb[12].mxu1 }
 0x55f   : > { %v2319_v47 = vpop.f32.mrb[13].mxu1 }
 0x560   : > { %v1220_v48 = vpop.f32.mrb[14].mxu1 }
 0x561   : > { %v2320_v49 = vpop.f32.mrb[15].mxu1 }
 0x566   : > { %v1263_v50 = vpop.f32.mrb[16].mxu1 }
 0x567   : > { %v1269_v51 = vpack.c.bf16 %v1263_v50, %v1217_v46  ;;  %v2325_v52 = vpop.f32.mrb[17].mxu1  ;;  %v2542_v50 = vld [vmem:[%s3563_s2 + $0x40] sm:$0xff]  }
 0x568   : > { %v1266_v53 = vpop.f32.mrb[18].mxu1  ;;  %2261 = vmatprep.subr.bf16.mxu0 %v2542_v50  ;;  %v2544_v52 = vld [vmem:[%s3563_s2 + $0x48] sm:$0xff]  }
 0x569   : > { %v2326_v4 = vpop.f32.mrb[19].mxu1  ;;  %2344 = vmatmul.mubr.bf16.vlgmr.msra.gmra.mrb[4].mxu0 %v1269_v51  ;;  %v2543_v51 = vld [vmem:[%s3563_s2] sm:$0xff]   ;;  %v2545_v53 = vld [vmem:[%s3563_s2 + $0x8] sm:$0xff]  }
 0x56a   : > { %2262 = vmatpush3.bf16.msra.mxu0 %v2543_v51  ;;  %v2546_v4 = vld [vmem:[%s3563_s2 + $0x50] sm:$0xff]  }
 0x56b   : > { %2263 = vmatprep.subr.bf16.mxu0 %v2544_v52 }
 0x56e   : > { %2264 = vmatpush3.bf16.msra.mxu0 %v2545_v53 }
 0x56f   : > { %2265 = vmatprep.subr.bf16.mxu0 %v2546_v4 }
 0x63c   : > { %v1375_v55 = vpop.f32.mrb[4].mxu0 }
 0x63d   : > { %v1376_v56 = vadd.f32 %v2177_v54, %v1375_v55  ;;  %v2345_v57 = vpop.f32.mrb[5].mxu0  ;;  %v2548_v55 = vld [vmem:[%s3563_s2 + $0x58] sm:$0xff]  }
 0x63e   : > { %v1378_v5 = vpop.f32.mrb[6].mxu0  ;;  %v2550_v57 = vld [vmem:[%s3563_s2 + $0x60] sm:$0xff]  }
 0x63f   : > { %v3658_v58 = vadd.f32 %v1376_v56, %v3596_v25  ;;  %v1379_v59 = vadd.f32 %v2177_v54, %v1378_v5  ;;  %v2346_v60 = vpop.f32.mrb[7].mxu0  ;;  %v2547_v54 = vld [vmem:[%s3563_s2 + $0x10] sm:$0xff]   ;;  %v2549_v56 = vld [vmem:[%s3563_s2 + $0x18] sm:$0xff]   ;;  %v2551_v5 = vld [vmem:[%s3563_s2 + $0x20] sm:$0xff]  }
 0x640   : > { %2266 = vmatpush3.bf16.msra.mxu0 %v2547_v54  ;;  %v2554_v60 = vld [vmem:[%s3563_s2 + $0x70] sm:$0xff]  }
 0x641   : > { %v3661_v61 = vadd.f32 %v1379_v59, %v3598_v26  ;;  %1385 = vadd.xlane.f32.xlu0 %v3658_v58  ;;  %v1392_v62 = vmul.f32 %v3658_v58, %v3658_v58  ;;  %v2523_v26 = vld [vmem:[%s3560_s13 + $0x14] ss:$8 sps:$4 sm:$0xff]   ;;  %2267 = vmatprep.subr.bf16.mxu0 %v2548_v55  ;;  %v2553_v59 = vld [vmem:[%s3563_s2 + $0x28] sm:$0xff]  }
 0x642   : > { %1537 = vmatprep.subr.bf16.mxu1 %v2523_v26  ;;  %v1452_v26 = vrot.slane %v1443_v63, %v3617_v33  ;;  %v2202_v55 = vld [vmem:[%s661_s25] ss:$0 sm:$0xff] }
 0x643   : > { %1387 = vadd.xlane.f32.xlu1 %v3661_v61  ;;  %v1393_v25 = vmul.f32 %v3661_v61, %v3661_v61  ;;  %1538 = vmatpush1.bf16.msra.mxu1 %v2521_v1 }
 0x644   : > { %1539 = vmatprep.subr.bf16.mxu1 %v2526_v2  ;;  %2268 = vmatpush3.bf16.msra.mxu0 %v2549_v56 }
 0x645   : > { %1394 = vadd.xlane.f32.xlu0 %v1392_v62  ;;  %2269 = vmatprep.subr.bf16.mxu0 %v2550_v57  ;;  %v2556_v62 = vld [vmem:[%s3563_s2 + $0x78] sm:$0xff]  }
 0x647   : > { %1396 = vadd.xlane.f32.xlu1 %v1393_v25  ;;  %1540 = vmatpush1.bf16.msra.mxu1 %v2524_v3  ;;  %v2557_v25 = vld [vmem:[%s3563_s2 + $0x38] sm:$0xff]  }
 0x648   : > { %1541 = vmatprep.subr.bf16.mxu1 %v2529_v6  ;;  %2270 = vmatpush3.bf16.msra.mxu0 %v2551_v5 }
 0x64b   : > { %1542 = vmatpush1.bf16.msra.mxu1 %v2527_v7 }
 0x64c   : > { %1543 = vmatprep.subr.bf16.mxu1 %v2532_v8 }
 0x64f   : > { %1544 = vmatpush1.bf16.msra.mxu1 %v2530_v9 }
 0x650   : > { %1545 = vmatprep.subr.bf16.mxu1 %v2535_v10 }
 0x653   : > { %1546 = vmatpush1.bf16.msra.mxu1 %v2533_v11 }
 0x654   : > { %1547 = vmatprep.subr.bf16.mxu1 %v2538_v12 }
 0x657   : > { %1548 = vmatpush1.bf16.msra.mxu1 %v2536_v13 }
 0x658   : > { %1549 = vmatprep.subr.bf16.mxu1 %v2541_v14 }
 0x65b   : > { %1550 = vmatpush1.bf16.msra.mxu1 %v2539_v15 }
 0x6ce   : > { %v1386_v16 = vpop.xlane.xlu0 %1385 }
 0x6cf   : > { %v1390_v17 = vmul.f32 0.0078125, %v1386_v16 }
 0x6d0   : > { %v1388_v18 = vpop.xlane.xlu1 %1387 }
 0x6d1   : > { %v1391_v19 = vmul.f32 0.0078125, %v1388_v18  ;;  %v1400_v21 = vmul.f32 %v1390_v17, %v1390_v17  ;;  %v1406_v37 = vsub.f32 %v3658_v58, %v1390_v17  ;;  %v2552_v58 = vld [vmem:[%s3563_s2 + $0x68] sm:$0xff]  }
 0x6d2   : > { %v1395_v20 = vpop.xlane.xlu0 %1394  ;;  %2271 = vmatprep.subr.bf16.mxu0 %v2552_v58 }
 0x6d3   : > { %v1398_v22 = vmul.f32 0.0078125, %v1395_v20  ;;  %v1401_v24 = vmul.f32 %v1391_v19, %v1391_v19  ;;  %v1407_v40 = vsub.f32 %v3661_v61, %v1391_v19  ;;  %2272 = vmatpush3.bf16.msra.mxu0 %v2553_v59  ;;  %v2555_v61 = vld [vmem:[%s3563_s2 + $0x30] sm:$0xff]  }
 0x6d4   : > { %v1397_v23 = vpop.xlane.xlu1 %1396  ;;  %2273 = vmatprep.subr.bf16.mxu0 %v2554_v60 }
 0x6d5   : > { %v1402_v27 = vsub.f32 %v1398_v22, %v1400_v21  ;;  %v1399_v28 = vmul.f32 0.0078125, %v1397_v23 }
 0x6d7   : > { %v1404_v29 = vmax.f32 %v1402_v27, 0.0  ;;  %v1403_v30 = vsub.f32 %v1399_v28, %v1401_v24  ;;  %2274 = vmatpush3.bf16.msra.mxu0 %v2555_v61 }
 0x6d8   : > { %2275 = vmatprep.subr.bf16.mxu0 %v2556_v62 }
 0x6d9   : > { %v1408_v31 = vadd.f32 1e-07, %v1404_v29  ;;  %v1405_v32 = vmax.f32 %v1403_v30, 0.0 }
 0x6db   : > { %2566 = vrsqrt.f32 %v1408_v31  ;;  %v1409_v34 = vadd.f32 1e-07, %v1405_v32  ;;  %2276 = vmatpush3.bf16.msra.mxu0 %v2557_v25 }
 0x6dd   : > { %2568 = vrsqrt.f32 %v1409_v34 }
 0x6e5   : > { %v2567_v39 = vpop.eup %2566 }
 0x6e6   : > { %v1412_v41 = vmul.f32 %v2567_v39, %v1406_v37 }
 0x6e7   : > { %v2569_v42 = vpop.eup %2568 }
 0x6e8   : > { %v1413_v43 = vmul.f32 %v2569_v42, %v1407_v40  ;;  %v1418_v44 = vmul.f32 %v1417_v38, %v1412_v41 }
 0x6ea   : > { %v1419_v46 = vmul.f32 %v1417_v38, %v1413_v43  ;;  %v3691_v47 = vadd.f32 %v1423_v45, %v1418_v44 }
 0x6ec   : > { %v3693_v48 = vadd.f32 %v1423_v45, %v1419_v46 }
 0x6ee   : > { %v1426_v49 = vpack.c.bf16 %v3693_v48, %v3691_v47 }
 0x6f0   : > { %1568 = vmatmul.mubr.bf16.vlgmr.msra.gmra.mrb[20].mxu1 %v1426_v49 }
 0x7c3   : > { %v1569_v1 = vpop.f32.mrb[20].mxu1 }
 0x7c4   : > { %v1570_v2 = vadd.f32 %v1569_v1, %v1448_v0  ;;  %v1571_v3 = vpop.f32.mrb[21].mxu1 }
 0x7c5   : > { %v1572_v6 = vadd.f32 %v1571_v3, %v1452_v26  ;;  %v1573_v7 = vpop.f32.mrb[22].mxu1 }
 0x7c6   : > { %v1582_v8 = vmul.f32 0.044715, %v1570_v2  ;;  %v1574_v9 = vadd.f32 %v1573_v7, %v1448_v0  ;;  %v1575_v10 = vpop.f32.mrb[23].mxu1  ;;  %v1578_v41 = vmul.f32 0.5, %v1570_v2 }
 0x7c7   : > { %v1583_v11 = vmul.f32 0.044715, %v1572_v6  ;;  %v1576_v12 = vadd.f32 %v1575_v10, %v1452_v26  ;;  %v1579_v44 = vmul.f32 0.5, %v1572_v6 }
 0x7c8   : > { %v1586_v13 = vmul.f32 %v1582_v8, %v1570_v2  ;;  %v1584_v14 = vmul.f32 0.044715, %v1574_v9  ;;  %v1580_v42 = vmul.f32 0.5, %v1574_v9 }
 0x7c9   : > { %v1587_v15 = vmul.f32 %v1583_v11, %v1572_v6  ;;  %v1585_v16 = vmul.f32 0.044715, %v1576_v12  ;;  %v1581_v45 = vmul.f32 0.5, %v1576_v12 }
 0x7ca   : > { %v1590_v17 = vmul.f32 %v1586_v13, %v1570_v2  ;;  %v1588_v18 = vmul.f32 %v1584_v14, %v1574_v9 }
 0x7cb   : > { %v1591_v19 = vmul.f32 %v1587_v15, %v1572_v6  ;;  %v1589_v20 = vmul.f32 %v1585_v16, %v1576_v12  ;;  %v1792_v16 = vld [vmem:[%s679_s18] sm:$0x3] }
 0x7cc   : > { %v1594_v21 = vadd.f32 %v1590_v17, %v1570_v2  ;;  %v1592_v22 = vmul.f32 %v1588_v18, %v1574_v9  ;;  %v1826_v18 = vrot.slane %v1792_v16, %v3621_v36 }
 0x7cd   : > { %v1593_v23 = vmul.f32 %v1589_v20, %v1576_v12  ;;  %v1595_v24 = vadd.f32 %v1591_v19, %v1572_v6  ;;  %v1832_v20 = vrot.slane %v1792_v16, %v3617_v33 }
 0x7ce   : > { %v1598_v27 = vmul.f32 0.7978846, %v1594_v21  ;;  %v1596_v28 = vadd.f32 %v1592_v22, %v1574_v9 }
 0x7cf   : > { %v1597_v29 = vadd.f32 %v1593_v23, %v1576_v12  ;;  %v1599_v30 = vmul.f32 0.7978846, %v1595_v24 }
 0x7d0   : > { %2570 = vtanh.f32 %v1598_v27  ;;  %v1600_v31 = vmul.f32 0.7978846, %v1596_v28 }
 0x7d1   : > { %v1601_v32 = vmul.f32 0.7978846, %v1597_v29  ;;  %2572 = vtanh.f32 %v1599_v30 }
 0x7d2   : > { %2574 = vtanh.f32 %v1600_v31 }
 0x7d3   : > { %2576 = vtanh.f32 %v1601_v32 }
 0x7da   : > { %v2571_v34 = vpop.eup %2570 }
 0x7db   : > { %v2573_v35 = vpop.eup %2572  ;;  %v1606_v37 = vadd.f32 1.0, %v2571_v34 }
 0x7dc   : > { %v2575_v38 = vpop.eup %2574  ;;  %v1607_v39 = vadd.f32 1.0, %v2573_v35 }
 0x7dd   : > { %v2577_v40 = vpop.eup %2576  ;;  %v1608_v43 = vadd.f32 1.0, %v2575_v38  ;;  %v1610_v49 = vmul.f32 %v1606_v37, %v1578_v41 }
 0x7de   : > { %v1609_v46 = vadd.f32 1.0, %v2577_v40  ;;  %v1611_v51 = vmul.f32 %v1607_v39, %v1579_v44 }
 0x7df   : > { %v1612_v50 = vmul.f32 %v1608_v43, %v1580_v42 }
 0x7e0   : > { %v1613_v52 = vmul.f32 %v1609_v46, %v1581_v45 }
 0x7e1   : > { %v1614_v53 = vpack.c.bf16 %v1612_v50, %v1610_v49 }
 0x7e2   : > { %v1615_v4 = vpack.c.bf16 %v1613_v52, %v1611_v51 }
 0x7e4   : > { %1783 = vmatprep.mubr.bf16.mxu0 %v1615_v4 }
 0x7e5   : > { %1784 = vmatmul.mubr.bf16.vlgmr.msra.gmra.mrb[8].mxu0 %v1614_v53 }
 0x8b8   : > { %v2277_v54 = vpop.f32.mrb[8].mxu0 }
 0x8b9   : > { %v2278_v56 = vpop.f32.mrb[9].mxu0 }
 0x8ba   : > { %v2279_v57 = vadd.f32 %v2278_v56, %v2277_v54  ;;  %v2280_v5 = vpop.f32.mrb[10].mxu0 }
 0x8bb   : > { %v2281_v58 = vpop.f32.mrb[11].mxu0 }
 0x8bc   : > { %v1786_v59 = vadd.f32 %v2279_v57, %v2202_v55  ;;  %v2282_v60 = vadd.f32 %v2281_v58, %v2280_v5 }
 0x8be   : > { %v1789_v61 = vadd.f32 %v2282_v60, %v2202_v55  ;;  %v1793_v62 = vadd.f32 %v1786_v59, %v3691_v47 }
 0x8c0   : > { %1795 = vadd.xlane.f32.xlu0 %v1793_v62  ;;  %v1794_v25 = vadd.f32 %v1789_v61, %v3693_v48  ;;  %v1801_v63 = vmul.f32 %v1793_v62, %v1793_v62 }
 0x8c2   : > { %1797 = vadd.xlane.f32.xlu1 %v1794_v25  ;;  %v1802_v0 = vmul.f32 %v1794_v25, %v1794_v25 }
 0x8c4   : > { %1803 = vadd.xlane.f32.xlu0 %v1801_v63 }
 0x8c6   : > { %1805 = vadd.xlane.f32.xlu1 %v1802_v0 }
 0x94d   : > { %v1796_v26 = vpop.xlane.xlu0 %1795 }
 0x94e   : > { %v1799_v1 = vmul.f32 0.0078125, %v1796_v26 }
 0x94f   : > { %v1798_v2 = vpop.xlane.xlu1 %1797 }
 0x950   : > { %v1800_v3 = vmul.f32 0.0078125, %v1798_v2  ;;  %v1809_v7 = vmul.f32 %v1799_v1, %v1799_v1  ;;  %v1815_v17 = vsub.f32 %v1793_v62, %v1799_v1 }
 0x951   : > { %v1804_v6 = vpop.xlane.xlu0 %1803 }
 0x952   : > { %v1807_v8 = vmul.f32 0.0078125, %v1804_v6  ;;  %v1810_v10 = vmul.f32 %v1800_v3, %v1800_v3  ;;  %v1816_v21 = vsub.f32 %v1794_v25, %v1800_v3 }
 0x953   : > { %v1806_v9 = vpop.xlane.xlu1 %1805 }
 0x954   : > { %v1811_v11 = vsub.f32 %v1807_v8, %v1809_v7  ;;  %v1808_v47 = vmul.f32 0.0078125, %v1806_v9 }
 0x956   : > { %v1813_v12 = vmax.f32 %v1811_v11, 0.0  ;;  %v1812_v13 = vsub.f32 %v1808_v47, %v1810_v10 }
 0x958   : > { %v1817_v48 = vadd.f32 1e-07, %v1813_v12  ;;  %v1814_v14 = vmax.f32 %v1812_v13, 0.0 }
 0x95a   : > { %2578 = vrsqrt.f32 %v1817_v48  ;;  %v1818_v15 = vadd.f32 1e-07, %v1814_v14 }
 0x95c   : > { %2580 = vrsqrt.f32 %v1818_v15 }
 0x964   : > { %v2579_v19 = vpop.eup %2578 }
 0x965   : > { %v1821_v22 = vmul.f32 %v2579_v19, %v1815_v17 }
 0x966   : > { %v2581_v23 = vpop.eup %2580 }
 0x967   : > { %v1827_v24 = vmul.f32 %v1826_v18, %v1821_v22  ;;  %v1822_v27 = vmul.f32 %v2581_v23, %v1816_v21  ;;  %1839 = sbr.rel (%p3850_p1) target bundleno = 2416 (0x970), region = 124 }
 0x969   : > { %v1833_v28 = vadd.f32 %v1832_v20, %v1827_v24  ;;  %v1828_v29 = vmul.f32 %v1826_v18, %v1822_v27 }
 0x96b   : > { %1835 = vst [vmem:[#allocation2] sm:$0xff] %v1833_v28  ;;  %v1834_v30 = vadd.f32 %v1832_v20, %v1828_v29  ;;  %v1840_v31 = vmul.f32 (!%p3850_p1), 0.25, %v1833_v28 }
 0x96d   : > { %1836 = vst [vmem:[#allocation2 + $0x8] sm:$0xff] %v1834_v30  ;;  %v1841_v32 = vmul.f32 (!%p3850_p1), 0.25, %v1834_v30  ;;  %1842 = vst [vmem:[#allocation18] sm:$0xff] (!%p3850_p1), %v1840_v31 }
 0x96f   : > { %1843 = vst [vmem:[#allocation18 + $0x8] sm:$0xff] %v1841_v32 }
 0x970 PF: > { %s3851_s20 = sld [smem:[#allocation25_spill]] }
 0x976   : > { %p2220_p0 = scmp.le.s32.totalorder %s3851_s20, 0 }
 0x977   : > { %v1848_v33 = vld [vmem:[#allocation18] sm:$0xff] (!%p2220_p0)  ;;  %v1850_v36 = vmul.f32 (!%p2220_p0), 0.25, %v1833_v28  ;;  %v1849_v34 = vld [vmem:[#allocation18 + $0x8] sm:$0xff] (!%p2220_p0)  ;;  %v1851_v35 = vmul.f32 (!%p2220_p0), 0.25, %v1834_v30 }
 0x978   : > { %1847 = sbr.rel (%p2220_p0) target bundleno = 2431 (0x97f), region = 128 }
 0x979   : > { %v1852_v37 = vadd.f32 (!%p2220_p0), %v1850_v36, %v1848_v33  ;;  %v1853_v38 = vadd.f32 (!%p2220_p0), %v1851_v35, %v1849_v34 }
 0x97b   : > { %1854 = vst [vmem:[#allocation18] sm:$0xff] (!%p2220_p0), %v1852_v37  ;;  %1855 = vst [vmem:[#allocation18 + $0x8] sm:$0xff] (!%p2220_p0), %v1853_v38 }
 0x97f PF: > { %s3852_s12 = sld [smem:[#allocation25_spill]]  ;;  %s3035_s30 = smov [#allocation18]  }
 0x980   : > { %s1862_s14 = sshll.u32 %s3035_s30, 4  ;;  %s1863_s14 = int_to_ptr.vmem [resolvable:$true] %s1862_s14 }
 0x981   : > { %s2938_s27 = scalar_lea.vmem %s1863_s14, 256  ;;  %p2945_p12 = scmp.lt.s32.totalorder %s1863_s14, %s1863_s14 }
 0x982   : > { %p2939_p9 = scmp.ne.s32.totalorder %s1863_s14, %s2938_s27  ;;  %p2946_p7 = scmp.lt.s32.totalorder %s2938_s27, %s2938_s27 }
 0x984   : > { %p2947_p5 = por %p2946_p7, %p2945_p12 }
 0x985   : > { %p2428_p2 = scmp.eq.s32.totalorder %s3852_s12, 3 }
 0x987   : > { %p2940_p6 = pnand %p2939_p9, %p2428_p2 }
 0x989   : > { %p2941_p10 = pneg %p2940_p6 }
 0x98b   : > { %p2948_p3 = pnand %p2947_p5, %p2941_p10 }
 0x98d   : > { %2951 = shalt.err (!%p2948_p3)
}
 0x98e   : > { %s3853_s19 = sld [smem:[#allocation32_spill]] }
 0x994   : > { %s2952_s24 = scalar_lea.hbm %s3853_s19, 256 }
 0x995   : > { %p2953_p11 = scmp.ne.s32.totalorder %s3853_s19, %s2952_s24  ;;  %p2958_p13 = scmp.lt.u32.totalorder %s2952_s24, %s3853_s19 }
 0x997   : > { %p2954_p8 = pnand %p2953_p11, %p2428_p2 }
 0x999   : > { %p2955_p4 = pneg %p2954_p8 }
 0x99b   : > { %p2960_p1 = pnand %p2958_p13, %p2955_p4 }
 0x99d   : > { %2963 = shalt.err (!%p2960_p1)
}
 0x99e   : > { %s3036_s15 = smov 128   ;;  %s3037_s13 = smov 8  }
 0x99f   : > { %2382 = dma.vmem_to_hbm [thread:$0]  (%p2428_p2), %s1863_s14, 256, %s3853_s19, [#allocation5], %s3036_s15, %s3036_s15, %s3037_s13  }
 0x9a0   : > { %2993 = dma.done.wait (%p2428_p2), [#allocation5], 256  }
 0x9a1   : > { %2995 = vsyncadd (%p2428_p2), [#allocation5], 4294967040 }
 0x9a2 PF: > { %s3854_s24 = sld [smem:[#allocation26_spill]]  ;;  %s3855_s21 = sld [smem:[#allocation23_spill]] }
 0x9a3   : > { %s3856_s22 = sld [smem:[#allocation24_spill]]  ;;  %s3857_s23 = sld [smem:[#allocation27_spill]] }
 0x9a8   : > { %p22_p0 = scmp.ge.s32.totalorder %s3854_s24, 6  }
 0x9aa   :  { %24 = sbr.rel (!%p22_p0) target bundleno = 8 (0x8), region = 223 }
 0x9b1   :  { %1878 = vsyncpa [#allocation4], 1 }
 0x9b2   :  { %1880 = vsyncpa [#allocation4 + $0x1], 1 }
 0x9b3   :  { %1881 = vsyncpa [#allocation7], 1 }
 0x9b4   :  { %1882 = vsyncpa [#allocation5], 1 }
 0x9b5   :  { %1884 = vsyncpa [#allocation5 + $0x1], 1 }

</bundles_post_ra>
